<compile_context>
chip_gen: v7x
topology: tpu7x:2x2x1
jax: 0.10.0
libtpu: 0.0.40
codegen_flags: <defaults>
</compile_context>

<pallas_src>
import functools

import jax
import jax.numpy as jnp
import numpy as np
from jax.experimental import pallas as pl
from jax.experimental.pallas import tpu as pltpu

NEG_SLOPE = 0.1

# kernel-tap map: output parity r, padded offset a -> ConvTranspose kernel index
_KMAP = ((3, 1), (2, 0))


def _leaky(x):
    return jnp.where(x >= 0.0, x, NEG_SLOPE * x)


# ----------------------------- Pallas kernel --------------------------------
def _matmul_bias_lrelu_kernel(a_ref, b_ref, bias_ref, o_ref):
    # o = leaky_relu(a @ b + bias); bias broadcasts as (1, n) or (m, 1).
    acc = jnp.dot(a_ref[...], b_ref[...], preferred_element_type=jnp.float32)
    acc = acc + bias_ref[...]
    o_ref[...] = jnp.where(acc >= 0.0, acc, NEG_SLOPE * acc)


def leaky_matmul(a, b, bias, *, nm=1):
    """y = leaky_relu(a @ b + bias, 0.1) in one Pallas call.

    a: (m, k), b: (k, n), bias: (1, n) or (m, 1).  Inputs are cast to bf16
    (f32 MXU accumulation, f32 epilogue).  The output columns (lane dim) are
    split into `nm` parallel grid blocks (nm=2 feeds both v7x TensorCores).
    """
    m, k = a.shape
    k2, n = b.shape
    assert k == k2
    assert n % nm == 0 and (nm == 1 or (n // nm) % 128 == 0)
    bn = n // nm

    bias = bias.astype(jnp.float32)
    br, bc = bias.shape
    if bc == n:                                    # bias lies along the split dim
        bias_spec = pl.BlockSpec((br, bn), lambda i: (0, i))
    else:                                          # per-row bias, stays resident
        bias_spec = pl.BlockSpec((br, bc), lambda i: (0, 0))

    a = a.astype(jnp.bfloat16)
    b = b.astype(jnp.bfloat16)
    cost = pl.CostEstimate(
        flops=2 * m * k * n + 2 * m * n,
        transcendentals=0,
        bytes_accessed=2 * m * k + 2 * k * n + 4 * br * bc + 4 * m * n,
    )
    return pl.pallas_call(
        _matmul_bias_lrelu_kernel,
        out_shape=jax.ShapeDtypeStruct((m, n), jnp.float32),
        grid=(nm,),
        in_specs=[
            pl.BlockSpec((m, k), lambda i: (0, 0)),   # LHS resident across grid
            pl.BlockSpec((k, bn), lambda i: (0, i)),
            bias_spec,
        ],
        out_specs=pl.BlockSpec((m, bn), lambda i: (0, i)),
        compiler_params=pltpu.CompilerParams(
            dimension_semantics=("parallel",)),
        cost_estimate=cost,
    )(a, b, bias)


# ------------------- one-time weight preparation (init) ----------------------
def build_deconv_matrix(w, b):
    """PyTorch ConvTranspose2d(k=4,s=2,p=1) weight (Cin,Cout,4,4) + bias (Cout,)
    -> dense (9*Cin, 4*Cout) matrix / (4*Cout,) bias for the 3x3-patch, 4-parity
    (sub-pixel) matmul formulation.  Host-side numpy; called once at init."""
    cin, cout = int(w.shape[0]), int(w.shape[1])
    w_np = np.asarray(w, np.float32)
    wm = np.zeros((9 * cin, 4 * cout), np.float32)
    for dh in range(3):
        for dw in range(3):
            for r in range(2):
                a = dh - r
                if a < 0 or a > 1:
                    continue
                for c in range(2):
                    d = dw - c
                    if d < 0 or d > 1:
                        continue
                    kh = _KMAP[r][a]
                    kw = _KMAP[c][d]
                    row0 = (dh * 3 + dw) * cin
                    col0 = (2 * r + c) * cout
                    wm[row0:row0 + cin, col0:col0 + cout] = w_np[:, :, kh, kw]
    bm = np.tile(np.asarray(b, np.float32), 4)
    return wm, bm


def prepare_params(params):
    """Hoisted out of the forward: build dense matmul weights once, on device."""
    fast = {
        "lin_wT": jnp.asarray(np.asarray(params["lin_w"], np.float32).T,
                              dtype=jnp.bfloat16),                   # (latent, conv_dim)
        "lin_b": jnp.asarray(params["lin_b"], jnp.float32).reshape(1, -1),
        "convs": [],
    }
    for w_ct, b_ct in params["convs"]:
        wm, bm = build_deconv_matrix(w_ct, b_ct)
        fast["convs"].append({
            "wt": jnp.asarray(wm.T, dtype=jnp.bfloat16),              # (4*Cout, 9*Cin)
            "bt": jnp.asarray(bm, jnp.float32).reshape(-1, 1),        # (4*Cout, 1)
        })
    return fast


# ------------------------------ layout glue (XLA, under jit) ------------------
def im2col_3x3_T(x):
    """x: (N, C, H, W) -> (9*C, N*H*W); rows ordered (dh, dw, c), cols (n, h, w)."""
    n, c, h, w = x.shape
    xp = jnp.pad(x, ((0, 0), (0, 0), (1, 1), (1, 1)))
    taps = [xp[:, :, dh:dh + h, dw:dw + w] for dh in range(3) for dw in range(3)]
    p = jnp.stack(taps, axis=0)                 # (9, N, C, H, W)
    p = jnp.transpose(p, (0, 2, 1, 3, 4))       # (9, C, N, H, W)
    return p.reshape(9 * c, n * h * w)


def unparity_T(yt, n, h, w, cout):
    """yt: (4*Cout, N*H*W), rows (r, c, cout), cols (n, h, w) -> (N, Cout, 2H, 2W)."""
    y = yt.reshape(2, 2, cout, n, h, w)
    y = jnp.transpose(y, (3, 2, 4, 0, 5, 1))    # (n, cout, h, r, w, c)
    return y.reshape(n, cout, 2 * h, 2 * w)


# ------------------------------ parameters -----------------------------------
def init_params(key, latent_dim, num_filters, num_channels):
    conv_dim = num_filters * 4 ** 3
    chans = [conv_dim // 16, num_filters * 8, num_filters * 4,
             num_filters * 2, num_channels]
    keys = jax.random.split(key, 10)
    bound = 1.0 / np.sqrt(latent_dim)
    params = {
        "lin_w": jax.random.uniform(keys[0], (conv_dim, latent_dim),
                                    jnp.float32, -bound, bound),
        "lin_b": jax.random.uniform(keys[1], (conv_dim,),
                                    jnp.float32, -bound, bound),
    }
    convs = []
    for li in range(4):
        cin, cout = chans[li], chans[li + 1]
        bound = 1.0 / np.sqrt(cin * 16)
        wk = jax.random.uniform(keys[2 + 2 * li], (cin, cout, 4, 4),
                                jnp.float32, -bound, bound)
        bk = jax.random.uniform(keys[3 + 2 * li], (cout,),
                                jnp.float32, -bound, bound)
        convs.append((wk, bk))
    params["convs"] = convs
    return params


# ------------------------------ forward pass ----------------------------------
@functools.partial(jax.jit, static_argnames=("batch_size", "dim"))
def emission_decoder_swe_forward(zts, fast_params, *, batch_size, dim):
    b, g, latent = zts.shape
    z = zts.reshape(b * g, latent)
    conv_dim = fast_params["lin_wT"].shape[1]
    # Linear + LeakyReLU (output lane dim = conv_dim = 128 -> already lane-dense)
    h = leaky_matmul(z, fast_params["lin_wT"], fast_params["lin_b"])
    # UnFlatten(4): (N, conv_dim // 16, 4, 4), NCHW
    x = h.reshape(b * g, conv_dim // 16, 4, 4)
    # 4x (ConvTranspose2d(k=4,s=2,p=1) + LeakyReLU): each one transposed,
    # lane-dense Pallas matmul over the 3x3-patch / 4-parity decomposition.
    for layer in fast_params["convs"]:
        n, _, hh, ww = x.shape
        cout = layer["wt"].shape[0] // 4
        m_lanes = n * hh * ww
        nm = 2 if (m_lanes >= 1024 and m_lanes % 256 == 0) else 1
        yt = leaky_matmul(layer["wt"], im2col_3x3_T(x), layer["bt"], nm=nm)
        x = unparity_T(yt, n, hh, ww, cout)
    # final PyTorch view: [B, N//B, dim, dim]
    return x.reshape(batch_size, x.shape[0] // batch_size, dim, dim)


# ------------------------------ pure-JAX reference -----------------------------
def ref_forward(zts, params, batch_size, dim):
    b, g, latent = zts.shape
    z = zts.reshape(b * g, latent)
    conv_dim = params["lin_w"].shape[0]
    h = _leaky(jnp.matmul(z, jnp.transpose(params["lin_w"]),
                          precision=jax.lax.Precision.HIGHEST) + params["lin_b"])
    x = h.reshape(b * g, conv_dim // 16, 4, 4)
    for w_ct, b_ct in params["convs"]:
        wf = jnp.flip(jnp.transpose(w_ct, (1, 0, 2, 3)), axis=(2, 3))
        x = jax.lax.conv_general_dilated(
            x, wf, window_strides=(1, 1), padding=((2, 2), (2, 2)),
            lhs_dilation=(2, 2), rhs_dilation=(1, 1),
            dimension_numbers=("NCHW", "OIHW", "NCHW"),
            precision=jax.lax.Precision.HIGHEST)
        x = _leaky(x + b_ct[None, :, None, None])
    return x.reshape(batch_size, x.shape[0] // batch_size, dim, dim)


if __name__ == "__main__":
    batch_size = 2
    generation_len = 3
    latent_dim = 8
    num_filters = 2
    num_channels = 1
    dim = 64  # fixed by UnFlatten(4) + four stride-2 transposed convs (4 -> 64)

    key = jax.random.PRNGKey(0)
    pkey, zkey = jax.random.split(key)
    params = init_params(pkey, latent_dim, num_filters, num_channels)
    fast_params = prepare_params(params)          # one-time weight rewrite
    zts = jax.random.normal(zkey, (batch_size, generation_len, latent_dim),
                            jnp.float32)

    out = emission_decoder_swe_forward(zts, fast_params,
                                       batch_size=batch_size, dim=dim)
    out = jax.block_until_ready(out)
    assert out.shape == (batch_size, generation_len, dim, dim), out.shape

    ref = jax.block_until_ready(ref_forward(zts, params, batch_size, dim))
    if not np.allclose(np.asarray(out), np.asarray(ref), atol=2e-2, rtol=2e-2):
        max_err = float(jnp.max(jnp.abs(out - ref)))
        raise AssertionError(f"mismatch vs reference, max abs err {max_err}")
    print("KERNEL_OK")
</pallas_src>

<mosaic_0001>
module attributes {stable_mosaic.version = 11 : i64} {
  func.func @_matmul_bias_lrelu_kernel(%arg0: i32, %arg1: memref<6x8xbf16, #tpu.memory_space<vmem>>, %arg2: memref<8x128xbf16, #tpu.memory_space<vmem>>, %arg3: memref<1x128xf32, #tpu.memory_space<vmem>>, %arg4: memref<6x128xf32, #tpu.memory_space<vmem>>) attributes {dimension_semantics = [#tpu.dimension_semantics<parallel>], iteration_bounds = array<i64: 1>, scalar_prefetch = 0 : i64, scratch_operands = 0 : i64, tpu.core_type = #tpu.core_type<tc>, window_params = [{pipeline_mode = #tpu.pipeline_mode<synchronous>, transform_indices = @transform_0, window_bounds = array<i64: 6, 8>}, {transform_indices = @transform_1, window_bounds = array<i64: 8, 128>}, {transform_indices = @transform_2, window_bounds = array<i64: 1, 128>}, {transform_indices = @transform_3, window_bounds = array<i64: 6, 128>}]} {
    %c0 = arith.constant 0 : index
    %c0_0 = arith.constant 0 : index
    %0 = vector.load %arg1[%c0, %c0_0] : memref<6x8xbf16, #tpu.memory_space<vmem>>, vector<6x8xbf16>
    %c0_1 = arith.constant 0 : index
    %c0_2 = arith.constant 0 : index
    %1 = vector.load %arg2[%c0_1, %c0_2] : memref<8x128xbf16, #tpu.memory_space<vmem>>, vector<8x128xbf16>
    %cst = arith.constant dense<0.000000e+00> : vector<6x128xf32>
    %2 = tpu.matmul %0, %1, %cst {dimension_numbers = #tpu.dot_dimension_numbers<[1], [0], [0], [1], [0, 0, 1, 1], [], []>} : vector<6x8xbf16>, vector<8x128xbf16>, vector<6x128xf32> -> vector<6x128xf32>
    %c0_3 = arith.constant 0 : index
    %c0_4 = arith.constant 0 : index
    %3 = vector.load %arg3[%c0_3, %c0_4] : memref<1x128xf32, #tpu.memory_space<vmem>>, vector<1x128xf32>
    %4 = vector.broadcast %3 : vector<1x128xf32> to vector<6x128xf32>
    %5 = arith.addf %2, %4 : vector<6x128xf32>
    %cst_5 = arith.constant 0.000000e+00 : f32
    %6 = vector.broadcast %cst_5 : f32 to vector<6x128xf32>
    %7 = arith.cmpf oge, %5, %6 : vector<6x128xf32>
    %cst_6 = arith.constant 1.000000e-01 : f32
    %8 = vector.broadcast %cst_6 : f32 to vector<6x128xf32>
    %9 = arith.mulf %8, %5 : vector<6x128xf32>
    %10 = arith.select %7, %5, %9 : vector<6x128xi1>, vector<6x128xf32>
    %c0_7 = arith.constant 0 : index
    %c0_8 = arith.constant 0 : index
    %11 = vector.load %arg4[%c0_7, %c0_8] : memref<6x128xf32, #tpu.memory_space<vmem>>, vector<6x128xf32>
    tpu.vector_store %arg4[%c0_7, %c0_8], %10 {strides = array<i32>} : memref<6x128xf32, #tpu.memory_space<vmem>>, vector<6x128xf32>,
    return
  }
  func.func @transform_0(%arg0: i32) -> (i32, i32) {
    %c0_i32 = arith.constant 0 : i32
    %c0_i32_0 = arith.constant 0 : i32
    %c0_i32_1 = arith.constant 0 : i32
    return %c0_i32, %c0_i32_0 : i32, i32
  }
  func.func @transform_1(%arg0: i32) -> (i32, i32) {
    %c0_i32 = arith.constant 0 : i32
    %c0_i32_0 = arith.constant 0 : i32
    return %c0_i32, %arg0 : i32, i32
  }
  func.func @transform_2(%arg0: i32) -> (i32, i32) {
    %c0_i32 = arith.constant 0 : i32
    %c0_i32_0 = arith.constant 0 : i32
    return %c0_i32, %arg0 : i32, i32
  }
  func.func @transform_3(%arg0: i32) -> (i32, i32) {
    %c0_i32 = arith.constant 0 : i32
    %c0_i32_0 = arith.constant 0 : i32
    return %c0_i32, %arg0 : i32, i32
  }
}

module attributes {stable_mosaic.version = 11 : i64} {
  func.func @_matmul_bias_lrelu_kernel(%arg0: i32, %arg1: memref<64x72xbf16, #tpu.memory_space<vmem>>, %arg2: memref<72x96xbf16, #tpu.memory_space<vmem>>, %arg3: memref<64x1xf32, #tpu.memory_space<vmem>>, %arg4: memref<64x96xf32, #tpu.memory_space<vmem>>) attributes {dimension_semantics = [#tpu.dimension_semantics<parallel>], iteration_bounds = array<i64: 1>, scalar_prefetch = 0 : i64, scratch_operands = 0 : i64, tpu.core_type = #tpu.core_type<tc>, window_params = [{pipeline_mode = #tpu.pipeline_mode<synchronous>, transform_indices = @transform_0, window_bounds = array<i64: 64, 72>}, {transform_indices = @transform_1, window_bounds = array<i64: 72, 96>}, {pipeline_mode = #tpu.pipeline_mode<synchronous>, transform_indices = @transform_2, window_bounds = array<i64: 64, 1>}, {transform_indices = @transform_3, window_bounds = array<i64: 64, 96>}]} {
    %c0 = arith.constant 0 : index
    %c0_0 = arith.constant 0 : index
    %0 = vector.load %arg1[%c0, %c0_0] : memref<64x72xbf16, #tpu.memory_space<vmem>>, vector<64x72xbf16>
    %c0_1 = arith.constant 0 : index
    %c0_2 = arith.constant 0 : index
    %1 = vector.load %arg2[%c0_1, %c0_2] : memref<72x96xbf16, #tpu.memory_space<vmem>>, vector<72x96xbf16>
    %cst = arith.constant dense<0.000000e+00> : vector<64x96xf32>
    %2 = tpu.matmul %0, %1, %cst {dimension_numbers = #tpu.dot_dimension_numbers<[1], [0], [0], [1], [0, 0, 1, 1], [], []>} : vector<64x72xbf16>, vector<72x96xbf16>, vector<64x96xf32> -> vector<64x96xf32>
    %c0_3 = arith.constant 0 : index
    %c0_4 = arith.constant 0 : index
    %3 = vector.load %arg3[%c0_3, %c0_4] : memref<64x1xf32, #tpu.memory_space<vmem>>, vector<64x1xf32>
    %4 = vector.broadcast %3 : vector<64x1xf32> to vector<64x96xf32>
    %5 = arith.addf %2, %4 : vector<64x96xf32>
    %cst_5 = arith.constant 0.000000e+00 : f32
    %6 = vector.broadcast %cst_5 : f32 to vector<64x96xf32>
    %7 = arith.cmpf oge, %5, %6 : vector<64x96xf32>
    %cst_6 = arith.constant 1.000000e-01 : f32
    %8 = vector.broadcast %cst_6 : f32 to vector<64x96xf32>
    %9 = arith.mulf %8, %5 : vector<64x96xf32>
    %10 = arith.select %7, %5, %9 : vector<64x96xi1>, vector<64x96xf32>
    %c0_7 = arith.constant 0 : index
    %c0_8 = arith.constant 0 : index
    %11 = vector.load %arg4[%c0_7, %c0_8] : memref<64x96xf32, #tpu.memory_space<vmem>>, vector<64x96xf32>
    tpu.vector_store %arg4[%c0_7, %c0_8], %10 {strides = array<i32>} : memref<64x96xf32, #tpu.memory_space<vmem>>, vector<64x96xf32>,
    return
  }
  func.func @transform_0(%arg0: i32) -> (i32, i32) {
    %c0_i32 = arith.constant 0 : i32
    %c0_i32_0 = arith.constant 0 : i32
    %c0_i32_1 = arith.constant 0 : i32
    return %c0_i32, %c0_i32_0 : i32, i32
  }
  func.func @transform_1(%arg0: i32) -> (i32, i32) {
    %c0_i32 = arith.constant 0 : i32
    %c0_i32_0 = arith.constant 0 : i32
    return %c0_i32, %arg0 : i32, i32
  }
  func.func @transform_2(%arg0: i32) -> (i32, i32) {
    %c0_i32 = arith.constant 0 : i32
    %c0_i32_0 = arith.constant 0 : i32
    %c0_i32_1 = arith.constant 0 : i32
    return %c0_i32, %c0_i32_0 : i32, i32
  }
  func.func @transform_3(%arg0: i32) -> (i32, i32) {
    %c0_i32 = arith.constant 0 : i32
    %c0_i32_0 = arith.constant 0 : i32
    return %c0_i32, %arg0 : i32, i32
  }
}

module attributes {stable_mosaic.version = 11 : i64} {
  func.func @_matmul_bias_lrelu_kernel(%arg0: i32, %arg1: memref<32x144xbf16, #tpu.memory_space<vmem>>, %arg2: memref<144x384xbf16, #tpu.memory_space<vmem>>, %arg3: memref<32x1xf32, #tpu.memory_space<vmem>>, %arg4: memref<32x384xf32, #tpu.memory_space<vmem>>) attributes {dimension_semantics = [#tpu.dimension_semantics<parallel>], iteration_bounds = array<i64: 1>, scalar_prefetch = 0 : i64, scratch_operands = 0 : i64, tpu.core_type = #tpu.core_type<tc>, window_params = [{pipeline_mode = #tpu.pipeline_mode<synchronous>, transform_indices = @transform_0, window_bounds = array<i64: 32, 144>}, {transform_indices = @transform_1, window_bounds = array<i64: 144, 384>}, {pipeline_mode = #tpu.pipeline_mode<synchronous>, transform_indices = @transform_2, window_bounds = array<i64: 32, 1>}, {transform_indices = @transform_3, window_bounds = array<i64: 32, 384>}]} {
    %c0 = arith.constant 0 : index
    %c0_0 = arith.constant 0 : index
    %0 = vector.load %arg1[%c0, %c0_0] : memref<32x144xbf16, #tpu.memory_space<vmem>>, vector<32x144xbf16>
    %c0_1 = arith.constant 0 : index
    %c0_2 = arith.constant 0 : index
    %1 = vector.load %arg2[%c0_1, %c0_2] : memref<144x384xbf16, #tpu.memory_space<vmem>>, vector<144x384xbf16>
    %cst = arith.constant dense<0.000000e+00> : vector<32x384xf32>
    %2 = tpu.matmul %0, %1, %cst {dimension_numbers = #tpu.dot_dimension_numbers<[1], [0], [0], [1], [0, 0, 1, 1], [], []>} : vector<32x144xbf16>, vector<144x384xbf16>, vector<32x384xf32> -> vector<32x384xf32>
    %c0_3 = arith.constant 0 : index
    %c0_4 = arith.constant 0 : index
    %3 = vector.load %arg3[%c0_3, %c0_4] : memref<32x1xf32, #tpu.memory_space<vmem>>, vector<32x1xf32>
    %4 = vector.broadcast %3 : vector<32x1xf32> to vector<32x384xf32>
    %5 = arith.addf %2, %4 : vector<32x384xf32>
    %cst_5 = arith.constant 0.000000e+00 : f32
    %6 = vector.broadcast %cst_5 : f32 to vector<32x384xf32>
    %7 = arith.cmpf oge, %5, %6 : vector<32x384xf32>
    %cst_6 = arith.constant 1.000000e-01 : f32
    %8 = vector.broadcast %cst_6 : f32 to vector<32x384xf32>
    %9 = arith.mulf %8, %5 : vector<32x384xf32>
    %10 = arith.select %7, %5, %9 : vector<32x384xi1>, vector<32x384xf32>
    %c0_7 = arith.constant 0 : index
    %c0_8 = arith.constant 0 : index
    %11 = vector.load %arg4[%c0_7, %c0_8] : memref<32x384xf32, #tpu.memory_space<vmem>>, vector<32x384xf32>
    tpu.vector_store %arg4[%c0_7, %c0_8], %10 {strides = array<i32>} : memref<32x384xf32, #tpu.memory_space<vmem>>, vector<32x384xf32>,
    return
  }
  func.func @transform_0(%arg0: i32) -> (i32, i32) {
    %c0_i32 = arith.constant 0 : i32
    %c0_i32_0 = arith.constant 0 : i32
    %c0_i32_1 = arith.constant 0 : i32
    return %c0_i32, %c0_i32_0 : i32, i32
  }
  func.func @transform_1(%arg0: i32) -> (i32, i32) {
    %c0_i32 = arith.constant 0 : i32
    %c0_i32_0 = arith.constant 0 : i32
    return %c0_i32, %arg0 : i32, i32
  }
  func.func @transform_2(%arg0: i32) -> (i32, i32) {
    %c0_i32 = arith.constant 0 : i32
    %c0_i32_0 = arith.constant 0 : i32
    %c0_i32_1 = arith.constant 0 : i32
    return %c0_i32, %c0_i32_0 : i32, i32
  }
  func.func @transform_3(%arg0: i32) -> (i32, i32) {
    %c0_i32 = arith.constant 0 : i32
    %c0_i32_0 = arith.constant 0 : i32
    return %c0_i32, %arg0 : i32, i32
  }
}

module attributes {stable_mosaic.version = 11 : i64} {
  func.func @_matmul_bias_lrelu_kernel(%arg0: i32, %arg1: memref<16x72xbf16, #tpu.memory_space<vmem>>, %arg2: memref<72x768xbf16, #tpu.memory_space<vmem>>, %arg3: memref<16x1xf32, #tpu.memory_space<vmem>>, %arg4: memref<16x768xf32, #tpu.memory_space<vmem>>) attributes {dimension_semantics = [#tpu.dimension_semantics<parallel>], iteration_bounds = array<i64: 2>, scalar_prefetch = 0 : i64, scratch_operands = 0 : i64, tpu.core_type = #tpu.core_type<tc>, window_params = [{pipeline_mode = #tpu.pipeline_mode<synchronous>, transform_indices = @transform_0, window_bounds = array<i64: 16, 72>}, {transform_indices = @transform_1, window_bounds = array<i64: 72, 768>}, {pipeline_mode = #tpu.pipeline_mode<synchronous>, transform_indices = @transform_2, window_bounds = array<i64: 16, 1>}, {transform_indices = @transform_3, window_bounds = array<i64: 16, 768>}]} {
    %c0 = arith.constant 0 : index
    %c0_0 = arith.constant 0 : index
    %0 = vector.load %arg1[%c0, %c0_0] : memref<16x72xbf16, #tpu.memory_space<vmem>>, vector<16x72xbf16>
    %c0_1 = arith.constant 0 : index
    %c0_2 = arith.constant 0 : index
    %1 = vector.load %arg2[%c0_1, %c0_2] : memref<72x768xbf16, #tpu.memory_space<vmem>>, vector<72x768xbf16>
    %cst = arith.constant dense<0.000000e+00> : vector<16x768xf32>
    %2 = tpu.matmul %0, %1, %cst {dimension_numbers = #tpu.dot_dimension_numbers<[1], [0], [0], [1], [0, 0, 1, 1], [], []>} : vector<16x72xbf16>, vector<72x768xbf16>, vector<16x768xf32> -> vector<16x768xf32>
    %c0_3 = arith.constant 0 : index
    %c0_4 = arith.constant 0 : index
    %3 = vector.load %arg3[%c0_3, %c0_4] : memref<16x1xf32, #tpu.memory_space<vmem>>, vector<16x1xf32>
    %4 = vector.broadcast %3 : vector<16x1xf32> to vector<16x768xf32>
    %5 = arith.addf %2, %4 : vector<16x768xf32>
    %cst_5 = arith.constant 0.000000e+00 : f32
    %6 = vector.broadcast %cst_5 : f32 to vector<16x768xf32>
    %7 = arith.cmpf oge, %5, %6 : vector<16x768xf32>
    %cst_6 = arith.constant 1.000000e-01 : f32
    %8 = vector.broadcast %cst_6 : f32 to vector<16x768xf32>
    %9 = arith.mulf %8, %5 : vector<16x768xf32>
    %10 = arith.select %7, %5, %9 : vector<16x768xi1>, vector<16x768xf32>
    %c0_7 = arith.constant 0 : index
    %c0_8 = arith.constant 0 : index
    %11 = vector.load %arg4[%c0_7, %c0_8] : memref<16x768xf32, #tpu.memory_space<vmem>>, vector<16x768xf32>
    tpu.vector_store %arg4[%c0_7, %c0_8], %10 {strides = array<i32>} : memref<16x768xf32, #tpu.memory_space<vmem>>, vector<16x768xf32>,
    return
  }
  func.func @transform_0(%arg0: i32) -> (i32, i32) {
    %c0_i32 = arith.constant 0 : i32
    %c0_i32_0 = arith.constant 0 : i32
    %c0_i32_1 = arith.constant 0 : i32
    return %c0_i32, %c0_i32_0 : i32, i32
  }
  func.func @transform_1(%arg0: i32) -> (i32, i32) {
    %c0_i32 = arith.constant 0 : i32
    %c0_i32_0 = arith.constant 0 : i32
    return %c0_i32, %arg0 : i32, i32
  }
  func.func @transform_2(%arg0: i32) -> (i32, i32) {
    %c0_i32 = arith.constant 0 : i32
    %c0_i32_0 = arith.constant 0 : i32
    %c0_i32_1 = arith.constant 0 : i32
    return %c0_i32, %c0_i32_0 : i32, i32
  }
  func.func @transform_3(%arg0: i32) -> (i32, i32) {
    %c0_i32 = arith.constant 0 : i32
    %c0_i32_0 = arith.constant 0 : i32
    return %c0_i32, %arg0 : i32, i32
  }
}

module attributes {stable_mosaic.version = 11 : i64} {
  func.func @_matmul_bias_lrelu_kernel(%arg0: i32, %arg1: memref<4x36xbf16, #tpu.memory_space<vmem>>, %arg2: memref<36x3072xbf16, #tpu.memory_space<vmem>>, %arg3: memref<4x1xf32, #tpu.memory_space<vmem>>, %arg4: memref<4x3072xf32, #tpu.memory_space<vmem>>) attributes {dimension_semantics = [#tpu.dimension_semantics<parallel>], iteration_bounds = array<i64: 2>, scalar_prefetch = 0 : i64, scratch_operands = 0 : i64, tpu.core_type = #tpu.core_type<tc>, window_params = [{pipeline_mode = #tpu.pipeline_mode<synchronous>, transform_indices = @transform_0, window_bounds = array<i64: 4, 36>}, {transform_indices = @transform_1, window_bounds = array<i64: 36, 3072>}, {pipeline_mode = #tpu.pipeline_mode<synchronous>, transform_indices = @transform_2, window_bounds = array<i64: 4, 1>}, {transform_indices = @transform_3, window_bounds = array<i64: 4, 3072>}]} {
    %c0 = arith.constant 0 : index
    %c0_0 = arith.constant 0 : index
    %0 = vector.load %arg1[%c0, %c0_0] : memref<4x36xbf16, #tpu.memory_space<vmem>>, vector<4x36xbf16>
    %c0_1 = arith.constant 0 : index
    %c0_2 = arith.constant 0 : index
    %1 = vector.load %arg2[%c0_1, %c0_2] : memref<36x3072xbf16, #tpu.memory_space<vmem>>, vector<36x3072xbf16>
    %cst = arith.constant dense<0.000000e+00> : vector<4x3072xf32>
    %2 = tpu.matmul %0, %1, %cst {dimension_numbers = #tpu.dot_dimension_numbers<[1], [0], [0], [1], [0, 0, 1, 1], [], []>} : vector<4x36xbf16>, vector<36x3072xbf16>, vector<4x3072xf32> -> vector<4x3072xf32>
    %c0_3 = arith.constant 0 : index
    %c0_4 = arith.constant 0 : index
    %3 = vector.load %arg3[%c0_3, %c0_4] : memref<4x1xf32, #tpu.memory_space<vmem>>, vector<4x1xf32>
    %4 = vector.broadcast %3 : vector<4x1xf32> to vector<4x3072xf32>
    %5 = arith.addf %2, %4 : vector<4x3072xf32>
    %cst_5 = arith.constant 0.000000e+00 : f32
    %6 = vector.broadcast %cst_5 : f32 to vector<4x3072xf32>
    %7 = arith.cmpf oge, %5, %6 : vector<4x3072xf32>
    %cst_6 = arith.constant 1.000000e-01 : f32
    %8 = vector.broadcast %cst_6 : f32 to vector<4x3072xf32>
    %9 = arith.mulf %8, %5 : vector<4x3072xf32>
    %10 = arith.select %7, %5, %9 : vector<4x3072xi1>, vector<4x3072xf32>
    %c0_7 = arith.constant 0 : index
    %c0_8 = arith.constant 0 : index
    %11 = vector.load %arg4[%c0_7, %c0_8] : memref<4x3072xf32, #tpu.memory_space<vmem>>, vector<4x3072xf32>
    tpu.vector_store %arg4[%c0_7, %c0_8], %10 {strides = array<i32>} : memref<4x3072xf32, #tpu.memory_space<vmem>>, vector<4x3072xf32>,
    return
  }
  func.func @transform_0(%arg0: i32) -> (i32, i32) {
    %c0_i32 = arith.constant 0 : i32
    %c0_i32_0 = arith.constant 0 : i32
    %c0_i32_1 = arith.constant 0 : i32
    return %c0_i32, %c0_i32_0 : i32, i32
  }
  func.func @transform_1(%arg0: i32) -> (i32, i32) {
    %c0_i32 = arith.constant 0 : i32
    %c0_i32_0 = arith.constant 0 : i32
    return %c0_i32, %arg0 : i32, i32
  }
  func.func @transform_2(%arg0: i32) -> (i32, i32) {
    %c0_i32 = arith.constant 0 : i32
    %c0_i32_0 = arith.constant 0 : i32
    %c0_i32_1 = arith.constant 0 : i32
    return %c0_i32, %c0_i32_0 : i32, i32
  }
  func.func @transform_3(%arg0: i32) -> (i32, i32) {
    %c0_i32 = arith.constant 0 : i32
    %c0_i32_0 = arith.constant 0 : i32
    return %c0_i32, %arg0 : i32, i32
  }
}

</mosaic_0001>

<bundles_post_ra>
// kernel: emission_decoder_swe_forward.5
= control target key start
LH: loop header
LB: loop body
LE: loop exit
PB: predicated region body
PF: predicated region fallthrough
CT: control target
= control target key end

     0   :  { %8 = vsyncpa [#allocation3], 0  ;;  %s222_s0 = inlined_call_operand.vmem [shape: bf16[6,8], index: 0, kind: input, shape index: {}]   ;;  %s223_s1 = inlined_call_operand.hbm [shape: bf16[8,128], index: 1, kind: input, shape index: {}]   ;;  %s224_s2 = inlined_call_operand.hbm [shape: f32[1,128], index: 2, kind: input, shape index: {}]   ;;  %s225_s3 = inlined_call_operand.vmem [shape: f32[6,128], index: 3, kind: output, shape index: {}]  }
   0x1   :  { %9 = vsyncpa [#allocation5], 0  ;;  %s168_s12 = smov [#allocation2]   ;;  %s169_s14 = smov [#allocation4]  }
   0x2   :  { %s18_s13 = sshll.u32 %s168_s12, 4  ;;  %s28_s15 = sshll.u32 %s169_s14, 4  ;;  %s19_s13 = int_to_ptr.vmem [resolvable:$true] %s18_s13  ;;  %s29_s15 = int_to_ptr.vmem [resolvable:$true] %s28_s15 }
   0x3   :  { %s120_s18 = scalar_lea.hbm %s223_s1, 64 }
   0x4   :  { %p121_p0 = scmp.ne.s32.totalorder %s223_s1, %s120_s18  ;;  %p124_p1 = scmp.lt.u32.totalorder %s120_s18, %s223_s1 }
   0x6   :  { %p126_p2 = pnand %p124_p1, %p121_p0 }
   0x8   :  { %129 = shalt.err (!%p126_p2)
}
   0x9   :  { %s130_s23 = scalar_lea.vmem %s19_s13, 64  ;;  %p135_p4 = scmp.lt.s32.totalorder %s19_s13, %s19_s13 }
   0xa   :  { %p131_p3 = scmp.ne.s32.totalorder %s19_s13, %s130_s23  ;;  %p136_p5 = scmp.lt.s32.totalorder %s130_s23, %s130_s23 }
   0xc   :  { %p137_p6 = por %p136_p5, %p135_p4 }
   0xe   :  { %p138_p7 = pnand %p137_p6, %p131_p3 }
  0x10   :  { %141 = shalt.err (!%p138_p7)
}
  0x11   :  { %21 = dma.hbm_to_vmem [thread:$0]  %s223_s1, 64, %s19_s13, [#allocation3]  }
  0x12   :  { %s142_s28 = scalar_lea.hbm %s224_s2, 16 }
  0x13   :  { %p143_p8 = scmp.ne.s32.totalorder %s224_s2, %s142_s28  ;;  %p146_p9 = scmp.lt.u32.totalorder %s142_s28, %s224_s2 }
  0x15   :  { %p148_p10 = pnand %p146_p9, %p143_p8 }
  0x17   :  { %151 = shalt.err (!%p148_p10)
}
  0x18   :  { %s152_s6 = scalar_lea.vmem %s29_s15, 16  ;;  %s156_s7 = scalar_lea.vmem %s29_s15, 32 }
  0x19   :  { %p153_p11 = scmp.ne.s32.totalorder %s29_s15, %s152_s6  ;;  %p157_p12 = scmp.lt.s32.totalorder %s29_s15, %s29_s15 }
  0x1a   :  { %p158_p13 = scmp.lt.s32.totalorder %s156_s7, %s152_s6 }
  0x1c   :  { %p159_p0 = por %p158_p13, %p157_p12 }
  0x1e   :  { %p160_p1 = pnand %p159_p0, %p153_p11 }
  0x20   :  { %163 = shalt.err (!%p160_p1)
}
  0x21   :  { %31 = dma.hbm_to_vmem [thread:$0]  %s224_s2, 16, %s29_s15, [#allocation5]  }
  0x22   :  { %164 = dma.done.wait [#allocation3], 64  }
  0x23   :  { %165 = vsyncadd [#allocation3], 4294967232 }
  0x24   :  { %166 = dma.done.wait [#allocation5], 16  }
  0x25   :  { %167 = vsyncadd [#allocation5], 4294967280  ;;  %v170_v0 = vmov 0.0   ;;  %vm171_vm0 = vmmov 0   ;;  %vm52_vm1 = vcmask 1043456   ;;  %vm48_vm2 = vcmask 64512  }
  0x26   :  { %110 = vmatprep.subr.bf16.mxu0 %v170_v0  ;;  %112 = vmatprep.mubr.msk.bf16.mxu0 %vm171_vm0, %v170_v0  ;;  %v40_v1 = vld [vmem:[#allocation2] sm:$0xf]  ;;  %v106_v4 = vld [vmem:[#allocation4] ss:$0 sm:$0xff] }
  0x27   :  { %v54_v2 = vsel %vm52_vm1, %v40_v1, 0  ;;  %v39_v3 = vld [vmem:[%s222_s0] sm:$0x7] }
  0x28   :  { %111 = vmatpush3.bf16.msra.mxu0 %v54_v2 }
  0x2b   :  { %113 = vmatmul.mubr.msk.bf16.vlgmr.msra.gmra.mrb[0].mxu0 %vm48_vm2, %v39_v3 }
  0xfe   :  { %v90_v5 = vpop.f32.mrb[0].mxu0 }
  0xff   :  { %v91_v6 = vadd.f32 %v106_v4, %v90_v5  ;;  %v114_v7 = vpop.f32.mrb[1].mxu0 }
 0x100   :  { %v93_v8 = vpop.f32.mrb[2].mxu0 }
 0x101   :  { %vm96_vm3 = vcmp.ge.f32.partialorder %v91_v6, 0.0  ;;  %v97_v9 = vmul.f32 0.1, %v91_v6  ;;  %v115_v10 = vpop.f32.mrb[3].mxu0 }
 0x103   :  { %v98_v11 = vsel %vm96_vm3, %v91_v6, %v97_v9 }
 0x104   :  { %99 = vst [vmem:[%s225_s3] sm:$0x3f] %v98_v11 }
 0x105   :  { %104 = vsyncpa [#allocation3], 1 }
 0x106   :  { %105 = vsyncpa [#allocation5], 1 }

// kernel: emission_decoder_swe_forward.6
= control target key start
LH: loop header
LB: loop body
LE: loop exit
PB: predicated region body
PF: predicated region fallthrough
CT: control target
= control target key end

     0   :  { %v310_v1 = vmov 0   ;;  %vm127_vm0 = vcmask 588800   ;;  %vm140_vm1 = vcmask 1043456   ;;  %vm233_vm2 = vcmask 785408   ;;  %s418_s1 = inlined_call_operand.vmem [shape: bf16[72,96], index: 1, kind: input, shape index: {}]   ;;  %s419_s0 = inlined_call_operand.vmem [shape: bf16[64,72], index: 0, kind: input, shape index: {}]   ;;  %s420_s2 = inlined_call_operand.vmem [shape: f32[64,1], index: 2, kind: input, shape index: {}]   ;;  %s421_s3 = inlined_call_operand.vmem [shape: f32[64,96], index: 3, kind: output, shape index: {}]  }
   0x1   :  { %v301_v0 = vld [vmem:[%s418_s1] sm:$0xff]   ;;  %300 = vset.pattern.permute.xlu1 %v310_v1  ;;  %299 = vset.pattern.permute.xlu0 %v310_v1  ;;  %v302_v2 = vld [vmem:[%s418_s1 + $0x8] sm:$0xff]   ;;  %v303_v3 = vld [vmem:[%s418_s1 + $0x10] sm:$0xff]  }
   0x2   :  { %268 = vmatprep.subr.bf16.mxu0 %v301_v0  ;;  %286 = vmatprep.subr.bf16.mxu1 %v301_v0  ;;  %v306_v4 = vld [vmem:[%s419_s0] sm:$0xff]   ;;  %v307_v5 = vld [vmem:[%s419_s0 + $0x10] sm:$0xff]   ;;  %v304_v6 = vld [vmem:[%s418_s1 + $0x18] sm:$0xff]  }
   0x3   :  { %269 = vmatpush3.bf16.msra.mxu0 %v301_v0  ;;  %291 = vmatpush3.bf16.msra.mxu1 %v301_v0  ;;  %v34_v7 = vld [vmem:[%s420_s2 + $0x10] sm:$0xff]  ;;  %v32_v8 = vld [vmem:[%s420_s2] sm:$0xff]  ;;  %v35_v9 = vld [vmem:[%s420_s2 + $0x18] sm:$0xff] }
   0x4   :  { %270 = vmatprep.subr.bf16.mxu0 %v302_v2  ;;  %287 = vmatprep.subr.bf16.mxu1 %v302_v2  ;;  %v33_v10 = vld [vmem:[%s420_s2 + $0x8] sm:$0xff]  ;;  %v305_v11 = vld [vmem:[%s418_s1 + $0x20] ss:$0 sps:$4 sm:$0xff]   ;;  %v309_v16 = vld [vmem:[%s419_s0 + $0x18] sm:$0xff]  }
   0x5   :  { %278 = vmatprep.mubr.msk.bf16.mxu0 %vm127_vm0, %v306_v4  ;;  %282 = vmatprep.mubr.msk.bf16.mxu1 %vm127_vm0, %v307_v5  ;;  %v37_v12 = vld [vmem:[%s420_s2 + $0x28] sm:$0xff]  ;;  %v36_v13 = vld [vmem:[%s420_s2 + $0x20] sm:$0xff]  ;;  %v142_v14 = vsel %vm140_vm1, %v305_v11, 0  ;;  %v39_v17 = vld [vmem:[%s420_s2 + $0x38] sm:$0xff] }
   0x6   :  { %52 = vperm.xlu1 %300, %v34_v7   ;;  %42 = vperm.xlu0 %299, %v32_v8   ;;  %v308_v15 = vld [vmem:[%s419_s0 + $0x8] sm:$0xff]   ;;  %v38_v18 = vld [vmem:[%s420_s2 + $0x30] sm:$0xff] }
   0x7   :  { %271 = vmatpush3.bf16.msra.mxu0 %v302_v2  ;;  %292 = vmatpush3.bf16.msra.mxu1 %v302_v2 }
   0x8   :  { %272 = vmatprep.subr.bf16.mxu0 %v303_v3  ;;  %288 = vmatprep.subr.bf16.mxu1 %v303_v3 }
   0xa   :  { %57 = vperm.xlu1 %300, %v35_v9   ;;  %47 = vperm.xlu0 %299, %v33_v10  }
   0xb   :  { %273 = vmatpush3.bf16.msra.mxu0 %v303_v3  ;;  %293 = vmatpush3.bf16.msra.mxu1 %v303_v3 }
   0xc   :  { %274 = vmatprep.subr.bf16.mxu0 %v304_v6  ;;  %289 = vmatprep.subr.bf16.mxu1 %v304_v6 }
   0xe   :  { %67 = vperm.xlu1 %300, %v37_v12   ;;  %62 = vperm.xlu0 %299, %v36_v13  }
   0xf   :  { %275 = vmatpush3.bf16.msra.mxu0 %v304_v6  ;;  %294 = vmatpush3.bf16.msra.mxu1 %v304_v6 }
  0x10   :  { %296 = vmatprep.subr.msk.bf16.mxu0 %vm140_vm1, %v305_v11  ;;  %297 = vmatprep.subr.msk.bf16.mxu1 %vm140_vm1, %v305_v11 }
  0x12   :  { %77 = vperm.xlu1 %300, %v39_v17   ;;  %72 = vperm.xlu0 %299, %v38_v18  }
  0x13   :  { %277 = vmatpush3.bf16.msra.mxu0 %v142_v14  ;;  %295 = vmatpush3.bf16.msra.mxu1 %v142_v14 }
  0x16   :  { %279 = vmatmul.mubr.msk.bf16.vlgmr.msra.gmra.mrb[0].mxu0 %vm127_vm0, %v308_v15  ;;  %283 = vmatmul.mubr.msk.bf16.vlgmr.msra.gmra.mrb[0].mxu1 %vm127_vm0, %v309_v16 }
  0x85   :  { %v43_v19 = vpop.permute.xlu0 %42  ;;  %v53_v20 = vpop.permute.xlu1 %52 }
  0x89   :  { %v48_v21 = vpop.permute.xlu0 %47  ;;  %v58_v22 = vpop.permute.xlu1 %57 }
  0x8d   :  { %v63_v23 = vpop.permute.xlu0 %62  ;;  %v68_v24 = vpop.permute.xlu1 %67 }
  0x91   :  { %v73_v25 = vpop.permute.xlu0 %72  ;;  %v78_v38 = vpop.permute.xlu1 %77 }
  0xe9   :  { %v280_v26 = vpop.f32.mrb[0].mxu0  ;;  %v284_v27 = vpop.f32.mrb[0].mxu1 }
  0xea   :  { %v187_v28 = vadd.f32 %v280_v26, %v53_v20  ;;  %v203_v29 = vadd.f32 %v284_v27, %v73_v25  ;;  %v178_v30 = vpop.f32.mrb[1].mxu0  ;;  %v194_v31 = vpop.f32.mrb[1].mxu1 }
  0xeb   :  { %v179_v32 = vadd.f32 %v178_v30, %v43_v19  ;;  %v195_v33 = vadd.f32 %v194_v31, %v63_v23  ;;  %v281_v34 = vpop.f32.mrb[2].mxu0  ;;  %v285_v35 = vpop.f32.mrb[2].mxu1 }
  0xec   :  { %vm211_vm3 = vcmp.ge.f32.partialorder %v187_v28, 0.0  ;;  %v219_v36 = vmul.f32 0.1, %v187_v28  ;;  %vm215_vm4 = vcmp.ge.f32.partialorder %v203_v29, 0.0  ;;  %v223_v37 = vmul.f32 0.1, %v203_v29 }
  0xed   :  { %vm209_vm5 = vcmp.ge.f32.partialorder %v179_v32, 0.0  ;;  %v217_v39 = vmul.f32 0.1, %v179_v32  ;;  %vm213_vm6 = vcmp.ge.f32.partialorder %v195_v33, 0.0  ;;  %v221_v40 = vmul.f32 0.1, %v195_v33 }
  0xee   :  { %v227_v41 = vsel %vm211_vm3, %v187_v28, %v219_v36  ;;  %v231_v42 = vsel %vm215_vm4, %v203_v29, %v223_v37  ;;  %v190_v43 = vadd.f32 %v281_v34, %v58_v22  ;;  %v206_v44 = vadd.f32 %v285_v35, %v78_v38  ;;  %v181_v45 = vpop.f32.mrb[3].mxu0  ;;  %v197_v46 = vpop.f32.mrb[3].mxu1 }
  0xef   :  { %236 = vst.msk [vmem:[%s421_s3 + $0x10] sm:$0xff] %vm233_vm2, %v227_v41  ;;  %240 = vst.msk [vmem:[%s421_s3 + $0x30] sm:$0xff] %vm233_vm2, %v231_v42  ;;  %v225_v47 = vsel %vm209_vm5, %v179_v32, %v217_v39  ;;  %v229_v48 = vsel %vm213_vm6, %v195_v33, %v221_v40  ;;  %v182_v49 = vadd.f32 %v181_v45, %v48_v21 }
  0xf0   :  { %v198_v50 = vadd.f32 %v197_v46, %v68_v24  ;;  %234 = vst.msk [vmem:[%s421_s3] sm:$0xff] %vm233_vm2, %v225_v47  ;;  %238 = vst.msk [vmem:[%s421_s3 + $0x20] sm:$0xff] %vm233_vm2, %v229_v48  ;;  %vm212_vm7 = vcmp.ge.f32.partialorder %v190_v43, 0.0  ;;  %v220_v51 = vmul.f32 0.1, %v190_v43  ;;  %vm216_vm8 = vcmp.ge.f32.partialorder %v206_v44, 0.0 }
  0xf1   :  { %v224_v52 = vmul.f32 0.1, %v206_v44  ;;  %vm210_vm9 = vcmp.ge.f32.partialorder %v182_v49, 0.0  ;;  %v218_v53 = vmul.f32 0.1, %v182_v49 }
  0xf2   :  { %vm214_vm10 = vcmp.ge.f32.partialorder %v198_v50, 0.0  ;;  %v222_v54 = vmul.f32 0.1, %v198_v50  ;;  %v228_v55 = vsel %vm212_vm7, %v190_v43, %v220_v51 }
  0xf3   :  { %v232_v56 = vsel %vm216_vm8, %v206_v44, %v224_v52  ;;  %237 = vst.msk [vmem:[%s421_s3 + $0x18] sm:$0xff] %vm233_vm2, %v228_v55  ;;  %v226_v57 = vsel %vm210_vm9, %v182_v49, %v218_v53 }
  0xf4   :  { %241 = vst.msk [vmem:[%s421_s3 + $0x38] sm:$0xff] %vm233_vm2, %v232_v56  ;;  %v230_v58 = vsel %vm214_vm10, %v198_v50, %v222_v54  ;;  %235 = vst.msk [vmem:[%s421_s3 + $0x8] sm:$0xff] %vm233_vm2, %v226_v57 }
  0xf5   :  { %239 = vst.msk [vmem:[%s421_s3 + $0x28] sm:$0xff] %vm233_vm2, %v230_v58 }

// kernel: emission_decoder_swe_forward.7
= control target key start
LH: loop header
LB: loop body
LE: loop exit
PB: predicated region body
PF: predicated region fallthrough
CT: control target
= control target key end

     0   :  { %v482_v0 = vmov 0   ;;  %vm241_vm0 = vcmask 130048   ;;  %s659_s1 = inlined_call_operand.vmem [shape: bf16[144,384], index: 1, kind: input, shape index: {}]   ;;  %s660_s0 = inlined_call_operand.vmem [shape: bf16[32,144], index: 0, kind: input, shape index: {}]   ;;  %s661_s2 = inlined_call_operand.vmem [shape: f32[32,1], index: 2, kind: input, shape index: {}]   ;;  %s662_s3 = inlined_call_operand.vmem [shape: f32[32,384], index: 3, kind: output, shape index: {}]  }
   0x1   :  { %301 = vmatprep.subr.bf16.mxu1 %v482_v0  ;;  %v440_v1 = vld [vmem:[%s659_s1 + $0x4] ss:$12 sps:$4 sm:$0xff]   ;;  %438 = vset.pattern.permute.xlu0 %v482_v0  ;;  %v442_v2 = vld [vmem:[%s659_s1 + $0x8] ss:$12 sps:$4 sm:$0xff]   ;;  %v443_v3 = vld [vmem:[%s659_s1] ss:$12 sps:$4 sm:$0xff]  }
   0x2   :  { %439 = vset.pattern.permute.xlu1 %v482_v0  ;;  %248 = vmatprep.subr.bf16.mxu0 %v440_v1  ;;  %v444_v4 = vld [vmem:[%s659_s1 + $0x1c] ss:$12 sps:$4 sm:$0xff]   ;;  %v446_v5 = vld [vmem:[%s659_s1 + $0x20] ss:$12 sps:$4 sm:$0xff]   ;;  %v447_v6 = vld [vmem:[%s659_s1 + $0x18] ss:$12 sps:$4 sm:$0xff]  }
   0x3   :  { %302 = vmatpush1.bf16.msra.mxu1 %v442_v2  ;;  %249 = vmatpush1.bf16.msra.mxu0 %v443_v3  ;;  %v448_v7 = vld [vmem:[%s659_s1 + $0x34] ss:$12 sps:$4 sm:$0xff]   ;;  %v450_v8 = vld [vmem:[%s659_s1 + $0x38] ss:$12 sps:$4 sm:$0xff]   ;;  %v451_v9 = vld [vmem:[%s659_s1 + $0x30] ss:$12 sps:$4 sm:$0xff]  }
   0x4   :  { %303 = vmatprep.subr.bf16.mxu1 %v482_v0  ;;  %250 = vmatprep.subr.bf16.mxu0 %v444_v4  ;;  %v452_v10 = vld [vmem:[%s659_s1 + $0x4c] ss:$12 sps:$4 sm:$0xff]   ;;  %v454_v11 = vld [vmem:[%s659_s1 + $0x50] ss:$12 sps:$4 sm:$0xff]   ;;  %v455_v12 = vld [vmem:[%s659_s1 + $0x48] ss:$12 sps:$4 sm:$0xff]  }
   0x5   :  { %v456_v13 = vld [vmem:[%s659_s1 + $0x64] ss:$12 sps:$4 sm:$0xff]   ;;  %v458_v14 = vld [vmem:[%s659_s1 + $0x68] ss:$12 sps:$4 sm:$0xff]   ;;  %v459_v15 = vld [vmem:[%s659_s1 + $0x60] ss:$12 sps:$4 sm:$0xff]  }
   0x6   :  { %v460_v16 = vld [vmem:[%s659_s1 + $0x7c] ss:$12 sps:$4 sm:$0xff]   ;;  %v462_v17 = vld [vmem:[%s659_s1 + $0x80] ss:$12 sps:$4 sm:$0xff]   ;;  %v463_v18 = vld [vmem:[%s659_s1 + $0x78] ss:$12 sps:$4 sm:$0xff]  }
   0x7   :  { %304 = vmatpush1.bf16.msra.mxu1 %v446_v5  ;;  %251 = vmatpush1.bf16.msra.mxu0 %v447_v6  ;;  %v464_v19 = vld [vmem:[%s659_s1 + $0x94] ss:$12 sps:$4 sm:$0xff]   ;;  %v478_v20 = vld [vmem:[%s660_s0 + $0x4] ss:$8 sps:$4 sm:$0xff]   ;;  %v467_v23 = vld [vmem:[%s659_s1 + $0x90] ss:$12 sps:$4 sm:$0xff]  }
   0x8   :  { %305 = vmatprep.subr.bf16.mxu1 %v482_v0  ;;  %252 = vmatprep.subr.bf16.mxu0 %v448_v7  ;;  %v466_v21 = vld [vmem:[%s659_s1 + $0x98] ss:$12 sps:$4 sm:$0xff]   ;;  %v57_v24 = vld [vmem:[%s661_s2 + $0x10] sm:$0xff]  ;;  %v56_v27 = vld [vmem:[%s661_s2 + $0x8] sm:$0xff] }
   0x9   :  { %v55_v22 = vld [vmem:[%s661_s2] sm:$0xff]  ;;  %v468_v25 = vld [vmem:[%s659_s1 + $0xac] ss:$12 sps:$4 sm:$0xff]   ;;  %435 = vmatprep.mubr.msk.bf16.mxu1 %vm241_vm0, %v478_v20  ;;  %433 = vmatprep.mubr.msk.bf16.mxu0 %vm241_vm0, %v478_v20  ;;  %v470_v26 = vld [vmem:[%s659_s1 + $0xb0] ss:$12 sps:$4 sm:$0xff]  }
   0xa   :  { %61 = vperm.xlu0 %438, %v55_v22   ;;  %71 = vperm.xlu1 %439, %v57_v24   ;;  %v471_v28 = vld [vmem:[%s659_s1 + $0xa8] ss:$12 sps:$4 sm:$0xff]   ;;  %v58_v29 = vld [vmem:[%s661_s2 + $0x18] sm:$0xff]  ;;  %v472_v30 = vld [vmem:[%s659_s1 + $0xc4] ss:$12 sps:$4 sm:$0xff]  }
   0xb   :  { %306 = vmatpush1.bf16.msra.mxu1 %v450_v8  ;;  %253 = vmatpush1.bf16.msra.mxu0 %v451_v9  ;;  %v474_v31 = vld [vmem:[%s659_s1 + $0xc8] ss:$12 sps:$4 sm:$0xff]   ;;  %v475_v32 = vld [vmem:[%s659_s1 + $0xc0] ss:$12 sps:$4 sm:$0xff]   ;;  %v481_v35 = vld [vmem:[%s660_s0 + $0x10] ss:$8 sps:$4 sm:$0xff]  }
   0xc   :  { %307 = vmatprep.subr.bf16.mxu1 %v482_v0  ;;  %254 = vmatprep.subr.bf16.mxu0 %v452_v10  ;;  %v476_v33 = vld [vmem:[%s660_s0] ss:$8 sps:$4 sm:$0xff]   ;;  %v479_v34 = vld [vmem:[%s660_s0 + $0x14] ss:$8 sps:$4 sm:$0xff]  }
   0xe   :  { %66 = vperm.xlu0 %438, %v56_v27   ;;  %76 = vperm.xlu1 %439, %v58_v29  }
   0xf   :  { %308 = vmatpush1.bf16.msra.mxu1 %v454_v11  ;;  %255 = vmatpush1.bf16.msra.mxu0 %v455_v12 }
  0x10   :  { %309 = vmatprep.subr.bf16.mxu1 %v482_v0  ;;  %256 = vmatprep.subr.bf16.mxu0 %v456_v13 }
  0x13   :  { %310 = vmatpush1.bf16.msra.mxu1 %v458_v14  ;;  %257 = vmatpush1.bf16.msra.mxu0 %v459_v15 }
  0x14   :  { %311 = vmatprep.subr.bf16.mxu1 %v482_v0  ;;  %258 = vmatprep.subr.bf16.mxu0 %v460_v16 }
  0x17   :  { %312 = vmatpush1.bf16.msra.mxu1 %v462_v17  ;;  %259 = vmatpush1.bf16.msra.mxu0 %v463_v18 }
  0x18   :  { %313 = vmatprep.subr.bf16.mxu1 %v482_v0  ;;  %260 = vmatprep.subr.bf16.mxu0 %v464_v19 }
  0x1b   :  { %314 = vmatpush1.bf16.msra.mxu1 %v466_v21  ;;  %261 = vmatpush1.bf16.msra.mxu0 %v467_v23 }
  0x1c   :  { %315 = vmatprep.subr.bf16.mxu1 %v482_v0  ;;  %262 = vmatprep.subr.bf16.mxu0 %v468_v25 }
  0x1f   :  { %316 = vmatpush1.bf16.msra.mxu1 %v470_v26  ;;  %263 = vmatpush1.bf16.msra.mxu0 %v471_v28 }
  0x20   :  { %317 = vmatprep.subr.bf16.mxu1 %v482_v0  ;;  %264 = vmatprep.subr.bf16.mxu0 %v472_v30 }
  0x23   :  { %318 = vmatpush1.bf16.msra.mxu1 %v474_v31  ;;  %265 = vmatpush1.bf16.msra.mxu0 %v475_v32 }
  0x26   :  { %334 = vmatmul.mubr.bf16.vlgmr.msra.gmra.mrb[0].mxu1 %v476_v33  ;;  %281 = vmatmul.mubr.bf16.vlgmr.msra.gmra.mrb[0].mxu0 %v476_v33 }
  0x27   :  { %436 = vmatprep.mubr.msk.bf16.mxu1 %vm241_vm0, %v479_v34  ;;  %434 = vmatprep.mubr.msk.bf16.mxu0 %vm241_vm0, %v479_v34 }
  0x2e   :  { %342 = vmatmul.mubr.bf16.gmra.mrb[4].mxu1 %v481_v35  ;;  %291 = vmatmul.mubr.bf16.gmra.mrb[4].mxu0 %v481_v35 }
  0x89   :  { %v62_v36 = vpop.permute.xlu0 %61  ;;  %v72_v37 = vpop.permute.xlu1 %71 }
  0x8d   :  { %v67_v39 = vpop.permute.xlu0 %66  ;;  %v77_v63 = vpop.permute.xlu1 %76 }
  0xf9   :  { %v335_v38 = vpop.f32.mrb[0].mxu1  ;;  %v282_v41 = vpop.f32.mrb[0].mxu0 }
  0xfa   :  { %v336_v40 = vadd.f32 %v335_v38, %v62_v36  ;;  %v337_v42 = vpop.f32.mrb[1].mxu1  ;;  %v283_v43 = vadd.f32 %v282_v41, %v62_v36  ;;  %v284_v44 = vpop.f32.mrb[1].mxu0 }
  0xfb   :  { %v338_v45 = vpop.f32.mrb[2].mxu1  ;;  %v285_v47 = vadd.f32 %v284_v44, %v62_v36  ;;  %v286_v49 = vpop.f32.mrb[2].mxu0 }
  0xfc   :  { %vm352_vm1 = vcmp.ge.f32.partialorder %v336_v40, 0.0  ;;  %v364_v46 = vmul.f32 0.1, %v336_v40  ;;  %v339_v48 = vadd.f32 %v338_v45, %v67_v39  ;;  %v340_v50 = vpop.f32.mrb[3].mxu1  ;;  %vm350_vm2 = vcmp.ge.f32.partialorder %v283_v43, 0.0  ;;  %v288_v53 = vpop.f32.mrb[3].mxu0 }
  0xfd   :  { %v362_v51 = vmul.f32 0.1, %v283_v43  ;;  %v287_v52 = vadd.f32 %v286_v49, %v67_v39  ;;  %vm351_vm3 = vcmp.ge.f32.partialorder %v285_v47, 0.0  ;;  %v363_v55 = vmul.f32 0.1, %v285_v47 }
  0xfe   :  { %v376_v54 = vsel %vm352_vm1, %v336_v40, %v364_v46  ;;  %vm355_vm4 = vcmp.ge.f32.partialorder %v339_v48, 0.0  ;;  %v367_v57 = vmul.f32 0.1, %v339_v48  ;;  %v289_v60 = vadd.f32 %v288_v53, %v67_v39 }
  0xff   :  { %388 = vst [vmem:[%s662_s3 + $0x10] sm:$0xff] %v376_v54  ;;  %v374_v56 = vsel %vm350_vm2, %v283_v43, %v362_v51  ;;  %vm353_vm5 = vcmp.ge.f32.partialorder %v287_v52, 0.0  ;;  %v365_v58 = vmul.f32 0.1, %v287_v52  ;;  %v375_v59 = vsel %vm351_vm3, %v285_v47, %v363_v55 }
 0x100   :  { %386 = vst [vmem:[%s662_s3] sm:$0xff] %v374_v56  ;;  %387 = vst [vmem:[%s662_s3 + $0x8] sm:$0xff] %v375_v59  ;;  %v379_v61 = vsel %vm355_vm4, %v339_v48, %v367_v57  ;;  %vm354_vm6 = vcmp.ge.f32.partialorder %v289_v60, 0.0  ;;  %v366_v1 = vmul.f32 0.1, %v289_v60 }
 0x101   :  { %v377_v62 = vsel %vm353_vm5, %v287_v52, %v365_v58  ;;  %v343_v0 = vpop.f32.mrb[4].mxu1  ;;  %391 = vst [vmem:[%s662_s3 + $0x28] sm:$0xff] %v379_v61  ;;  %v292_v3 = vpop.f32.mrb[4].mxu0 }
 0x102   :  { %389 = vst [vmem:[%s662_s3 + $0x18] sm:$0xff] %v377_v62  ;;  %v344_v2 = vadd.f32 %v343_v0, %v72_v37  ;;  %v345_v4 = vpop.f32.mrb[5].mxu1  ;;  %v293_v5 = vadd.f32 %v292_v3, %v72_v37  ;;  %v294_v6 = vpop.f32.mrb[5].mxu0  ;;  %v378_v8 = vsel %vm354_vm6, %v289_v60, %v366_v1 }
 0x103   :  { %v346_v7 = vpop.f32.mrb[6].mxu1  ;;  %v295_v10 = vadd.f32 %v294_v6, %v72_v37  ;;  %v296_v11 = vpop.f32.mrb[6].mxu0  ;;  %390 = vst [vmem:[%s662_s3 + $0x20] sm:$0xff] %v378_v8 }
 0x104   :  { %vm358_vm7 = vcmp.ge.f32.partialorder %v344_v2, 0.0  ;;  %v370_v9 = vmul.f32 0.1, %v344_v2  ;;  %v348_v12 = vpop.f32.mrb[7].mxu1  ;;  %vm356_vm8 = vcmp.ge.f32.partialorder %v293_v5, 0.0  ;;  %v347_v14 = vadd.f32 %v346_v7, %v77_v63  ;;  %v298_v16 = vpop.f32.mrb[7].mxu0 }
 0x105   :  { %v368_v13 = vmul.f32 0.1, %v293_v5  ;;  %v297_v15 = vadd.f32 %v296_v11, %v77_v63  ;;  %vm357_vm9 = vcmp.ge.f32.partialorder %v295_v10, 0.0  ;;  %v369_v18 = vmul.f32 0.1, %v295_v10 }
 0x106   :  { %v382_v17 = vsel %vm358_vm7, %v344_v2, %v370_v9  ;;  %v299_v19 = vadd.f32 %v298_v16, %v77_v63  ;;  %vm361_vm10 = vcmp.ge.f32.partialorder %v347_v14, 0.0  ;;  %v373_v21 = vmul.f32 0.1, %v347_v14 }
 0x107   :  { %394 = vst [vmem:[%s662_s3 + $0x40] sm:$0xff] %v382_v17  ;;  %v380_v20 = vsel %vm356_vm8, %v293_v5, %v368_v13  ;;  %vm359_vm11 = vcmp.ge.f32.partialorder %v297_v15, 0.0  ;;  %v381_v22 = vsel %vm357_vm9, %v295_v10, %v369_v18  ;;  %v371_v23 = vmul.f32 0.1, %v297_v15 }
 0x108   :  { %392 = vst [vmem:[%s662_s3 + $0x30] sm:$0xff] %v380_v20  ;;  %vm360_vm12 = vcmp.ge.f32.partialorder %v299_v19, 0.0  ;;  %v372_v24 = vmul.f32 0.1, %v299_v19  ;;  %393 = vst [vmem:[%s662_s3 + $0x38] sm:$0xff] %v381_v22  ;;  %v385_v25 = vsel %vm361_vm10, %v347_v14, %v373_v21 }
 0x109   :  { %397 = vst [vmem:[%s662_s3 + $0x58] sm:$0xff] %v385_v25  ;;  %v383_v26 = vsel %vm359_vm11, %v297_v15, %v371_v23 }
 0x10a   :  { %v384_v27 = vsel %vm360_vm12, %v299_v19, %v372_v24  ;;  %395 = vst [vmem:[%s662_s3 + $0x48] sm:$0xff] %v383_v26 }
 0x10b   :  { %396 = vst [vmem:[%s662_s3 + $0x50] sm:$0xff] %v384_v27 }

// kernel: emission_decoder_swe_forward.8
= control target key start
LH: loop header
LB: loop body
LE: loop exit
PB: predicated region body
PF: predicated region fallthrough
CT: control target
= control target key end

     0   :  { %s891_s12 = smov 0   ;;  %s893_s13 = smov 0   ;;  %s1086_s0 = inlined_call_operand.vmem [shape: bf16[16,72], index: 0, kind: input, shape index: {}]   ;;  %s1087_s1 = inlined_call_operand.vmem [shape: bf16[72,1536], index: 1, kind: input, shape index: {}]   ;;  %s1088_s2 = inlined_call_operand.vmem [shape: f32[16,1], index: 2, kind: input, shape index: {}]   ;;  %s1089_s3 = inlined_call_operand.vmem [shape: f32[16,1536], index: 3, kind: output, shape index: {}]  }
   0x1   :  { %s895_s14 = smov 0  }
   0x2 LB: > { %s726_s15 = sadd.s32 4294967295, %s868_s14   ;;  %s908_s16 = sadd.s32 1, %s868_s14   ;;  %s868_s14 = sphi %s895_s14, %s1093_s14   ;;  %s864_s13 = sphi %s893_s13, %s1092_s13   ;;  %s860_s12 = sphi %s891_s12, %s1091_s12  }
   0x3   : > { %s38_s17 = ssub.s32 %s868_s14, %s908_s16  ;;  %s41_s18 = sadd.s32 1, %s864_s13 }
   0x4   : > { %p39_p0 = scmp.eq.s32.totalorder %s38_s17, 0  ;;  %p48_p1 = scmp.ne.s32.totalorder %s864_s13, %s860_s12 }
   0x5   : > { %p49_p2 = scmp.eq.s32.totalorder %s868_s14, 0  ;;  %p99_p3 = scmp.eq.s32.totalorder %s726_s15, 1 }
   0x6   : > { %s919_s19 = scalar_select %p39_p0, %s864_s13, %s41_s18  }
   0x7   : > { %p50_p4 = por %p49_p2, %p48_p1  ;;  %p921_p5 = por %p99_p3, %p48_p1 }
   0x8   : > { %p729_p6 = scmp.ge.s32.totalorder %s868_s14, 2 }
   0xa   : > { %127 = sbr.rel (%p729_p6) target bundleno = 36 (0x24), region = 24 }
  0x11   : > { %130 = sbr.rel (!%p50_p4) target bundleno = 36 (0x24), region = 28  ;;  %s132_s21 = sand.u32 (%p50_p4), 1, %s864_s13  }
  0x12   : > { %s772_s22 = smul.u32 (%p50_p4), 24, %s868_s14 }
  0x13   : > { %s774_s23 = smul.u32 (%p50_p4), 216, %s132_s21 }
  0x14   : > { %s931_s26 = scalar_lea.vmem (%p50_p4), %s1087_s1, %s772_s22 }
  0x15   : > { %v150_v0 = vld [vmem:[%s931_s26] sm:$0xff] (%p50_p4)  ;;  %v152_v1 = vld [vmem:[%s931_s26 + $0x8] sm:$0xff] (%p50_p4)  ;;  %v154_v2 = vld [vmem:[%s931_s26 + $0x10] sm:$0xff] (%p50_p4)  ;;  %s936_s27 = scalar_lea.vmem (%p50_p4), [#allocation2], %s774_s23 }
  0x16   : > { %151 = vst [vmem:[%s936_s27] sm:$0xff] (%p50_p4), %v150_v0  ;;  %153 = vst [vmem:[%s936_s27 + $0x8] sm:$0xff] (%p50_p4), %v152_v1  ;;  %v156_v3 = vld [vmem:[%s931_s26 + $0x30] sm:$0xff] (%p50_p4)  ;;  %v158_v4 = vld [vmem:[%s931_s26 + $0x38] sm:$0xff] (%p50_p4) }
  0x17   : > { %155 = vst [vmem:[%s936_s27 + $0x10] sm:$0xff] (%p50_p4), %v154_v2  ;;  %v160_v5 = vld [vmem:[%s931_s26 + $0x40] sm:$0xff] (%p50_p4)  ;;  %157 = vst [vmem:[%s936_s27 + $0x18] sm:$0xff] (%p50_p4), %v156_v3  ;;  %v164_v7 = vld [vmem:[%s931_s26 + $0x68] sm:$0xff] (%p50_p4) }
  0x18   : > { %159 = vst [vmem:[%s936_s27 + $0x20] sm:$0xff] %v158_v4  ;;  %161 = vst [vmem:[%s936_s27 + $0x28] sm:$0xff] %v160_v5  ;;  %v162_v6 = vld [vmem:[%s931_s26 + $0x60] sm:$0xff]  ;;  %v166_v8 = vld [vmem:[%s931_s26 + $0x70] sm:$0xff] }
  0x19   : > { %163 = vst [vmem:[%s936_s27 + $0x30] sm:$0xff] %v162_v6  ;;  %165 = vst [vmem:[%s936_s27 + $0x38] sm:$0xff] %v164_v7  ;;  %v168_v9 = vld [vmem:[%s931_s26 + $0x90] sm:$0xff]  ;;  %v170_v10 = vld [vmem:[%s931_s26 + $0x98] sm:$0xff] }
  0x1a   : > { %167 = vst [vmem:[%s936_s27 + $0x40] sm:$0xff] %v166_v8  ;;  %v172_v11 = vld [vmem:[%s931_s26 + $0xa0] sm:$0xff]  ;;  %169 = vst [vmem:[%s936_s27 + $0x48] sm:$0xff] %v168_v9  ;;  %v176_v13 = vld [vmem:[%s931_s26 + $0xc8] sm:$0xff] }
  0x1b   : > { %171 = vst [vmem:[%s936_s27 + $0x50] sm:$0xff] %v170_v10  ;;  %173 = vst [vmem:[%s936_s27 + $0x58] sm:$0xff] %v172_v11  ;;  %v174_v12 = vld [vmem:[%s931_s26 + $0xc0] sm:$0xff]  ;;  %v178_v14 = vld [vmem:[%s931_s26 + $0xd0] sm:$0xff] }
  0x1c   : > { %175 = vst [vmem:[%s936_s27 + $0x60] sm:$0xff] %v174_v12  ;;  %177 = vst [vmem:[%s936_s27 + $0x68] sm:$0xff] %v176_v13  ;;  %v180_v15 = vld [vmem:[%s931_s26 + $0xf0] sm:$0xff]  ;;  %v182_v16 = vld [vmem:[%s931_s26 + $0xf8] sm:$0xff] }
  0x1d   : > { %179 = vst [vmem:[%s936_s27 + $0x70] sm:$0xff] %v178_v14  ;;  %v184_v17 = vld [vmem:[%s931_s26 + $0x100] sm:$0xff]  ;;  %181 = vst [vmem:[%s936_s27 + $0x78] sm:$0xff] %v180_v15  ;;  %v188_v19 = vld [vmem:[%s931_s26 + $0x128] sm:$0xff] }
  0x1e   : > { %183 = vst [vmem:[%s936_s27 + $0x80] sm:$0xff] %v182_v16  ;;  %185 = vst [vmem:[%s936_s27 + $0x88] sm:$0xff] %v184_v17  ;;  %v186_v18 = vld [vmem:[%s931_s26 + $0x120] sm:$0xff]  ;;  %v190_v20 = vld [vmem:[%s931_s26 + $0x130] sm:$0xff] }
  0x1f   : > { %187 = vst [vmem:[%s936_s27 + $0x90] sm:$0xff] %v186_v18  ;;  %189 = vst [vmem:[%s936_s27 + $0x98] sm:$0xff] %v188_v19  ;;  %v192_v21 = vld [vmem:[%s931_s26 + $0x150] sm:$0xff]  ;;  %v194_v22 = vld [vmem:[%s931_s26 + $0x158] sm:$0xff] }
  0x20   : > { %191 = vst [vmem:[%s936_s27 + $0xa0] sm:$0xff] %v190_v20  ;;  %v196_v23 = vld [vmem:[%s931_s26 + $0x160] sm:$0xff]  ;;  %193 = vst [vmem:[%s936_s27 + $0xa8] sm:$0xff] %v192_v21  ;;  %v200_v25 = vld [vmem:[%s931_s26 + $0x188] sm:$0xff] }
  0x21   : > { %195 = vst [vmem:[%s936_s27 + $0xb0] sm:$0xff] %v194_v22  ;;  %197 = vst [vmem:[%s936_s27 + $0xb8] sm:$0xff] %v196_v23  ;;  %v198_v24 = vld [vmem:[%s931_s26 + $0x180] sm:$0xff]  ;;  %v202_v26 = vld [vmem:[%s931_s26 + $0x190] sm:$0xff] }
  0x22   : > { %199 = vst [vmem:[%s936_s27 + $0xc0] sm:$0xff] %v198_v24  ;;  %201 = vst [vmem:[%s936_s27 + $0xc8] sm:$0xff] %v200_v25 }
  0x23   : > { %203 = vst [vmem:[%s936_s27 + $0xd0] sm:$0xff] %v202_v26 }
  0x24 PF: > { %p731_p7 = scmp.ge.s32.totalorder %s868_s14, 1  ;;  %p208_p8 = scmp.lt.s32.totalorder %s868_s14, 3 }
  0x26   : > { %p209_p9 = pnand %p731_p7, %p208_p8 }
  0x27   : > { %s215_s28 = sand.u32 (!%p209_p9), 1, %s860_s12   ;;  %v870_v27 = vmov (!%p209_p9), 0   ;;  %v269_v28 = vld [vmem:[%s1088_s2] sm:$0xff] (!%p209_p9)  ;;  %v270_v29 = vld [vmem:[%s1088_s2 + $0x8] sm:$0xff] (!%p209_p9)  ;;  %vm425_vm0 = vcmask (!%p209_p9), 1043456   ;;  %vm421_vm1 = vcmask (!%p209_p9), 588800  }
  0x28   : > { %212 = sbr.rel (%p209_p9) target bundleno = 314 (0x13a), region = 51  ;;  %476 = vmatprep.mubr.bf16.mxu0 (!%p209_p9), %v870_v27  ;;  %519 = vmatprep.mubr.bf16.mxu1 (!%p209_p9), %v870_v27  ;;  %v823_v52 = vld [vmem:[%s1086_s0] sm:$0xff] (!%p209_p9)  }
  0x29   : > { %s775_s29 = smul.u32 (!%p209_p9), 216, %s215_s28  ;;  %802 = vset.pattern.permute.xlu0 (!%p209_p9), %v870_v27 }
  0x2a   : > { %273 = vperm.xlu0 (!%p209_p9), %802, %v269_v28   ;;  %s776_s10 = smul.u32 (!%p209_p9), 96, %s215_s28 }
  0x2b   : > { %s1000_s7 = scalar_lea.vmem (!%p209_p9), [#allocation2], %s775_s29 }
  0x2c   : > { %v803_v30 = vld [vmem:[%s1000_s7 + $0x4] ss:$24 sps:$4 sm:$0xff] (!%p209_p9)   ;;  %v805_v31 = vld [vmem:[%s1000_s7] ss:$24 sps:$4 sm:$0xff] (!%p209_p9)   ;;  %v806_v32 = vld [vmem:[%s1000_s7 + $0x34] ss:$24 sps:$4 sm:$0xff] (!%p209_p9)  }
  0x2d   : > { %444 = vmatprep.subr.bf16.mxu0 (!%p209_p9), %v803_v30  ;;  %v808_v33 = vld [vmem:[%s1000_s7 + $0x30] ss:$24 sps:$4 sm:$0xff] (!%p209_p9)   ;;  %v809_v34 = vld [vmem:[%s1000_s7 + $0x64] ss:$24 sps:$4 sm:$0xff] (!%p209_p9)   ;;  %v811_v35 = vld [vmem:[%s1000_s7 + $0x60] ss:$24 sps:$4 sm:$0xff] (!%p209_p9)  }
  0x2e   : > { %445 = vmatpush1.bf16.msra.mxu0 (!%p209_p9), %v805_v31  ;;  %278 = vperm.xlu0 (!%p209_p9), %802, %v270_v29   ;;  %v815_v36 = vld [vmem:[%s1000_s7 + $0xc] ss:$24 sps:$4 sm:$0xff] (!%p209_p9)   ;;  %v817_v37 = vld [vmem:[%s1000_s7 + $0x8] ss:$24 sps:$4 sm:$0xff] (!%p209_p9)   ;;  %v820_v38 = vld [vmem:[%s1000_s7 + $0x3c] ss:$24 sps:$4 sm:$0xff] (!%p209_p9)  }
  0x2f   : > { %446 = vmatprep.subr.bf16.mxu0 %v806_v32  ;;  %v812_v39 = vld [vmem:[%s1000_s7 + $0x94] ss:$24 sps:$4 sm:$0xff]   ;;  %487 = vmatprep.subr.bf16.mxu1 %v815_v36  ;;  %v266_v40 = vld [vmem:[%s1000_s7 + $0xc0] sm:$0xff]  ;;  %v822_v41 = vld [vmem:[%s1000_s7 + $0x38] ss:$24 sps:$4 sm:$0xff]   ;;  %s1043_s11 = scalar_lea.vmem [#allocation3], %s776_s10 }
  0x30   : > { %488 = vmatpush1.bf16.msra.mxu1 %v817_v37  ;;  %v827_v42 = vld [vmem:[%s1000_s7 + $0x6c] ss:$24 sps:$4 sm:$0xff]   ;;  %v814_v43 = vld [vmem:[%s1000_s7 + $0x90] ss:$24 sps:$4 sm:$0xff]   ;;  %v758_v44 = vcombine.high %v266_v40, %v266_v40  ;;  %v757_v45 = vcombine.low %v266_v40, %v266_v40  ;;  %v833_v47 = vld [vmem:[%s1000_s7 + $0x9c] ss:$24 sps:$4 sm:$0xff]  }
  0x31   : > { %489 = vmatprep.subr.bf16.mxu1 %v820_v38  ;;  %v829_v46 = vld [vmem:[%s1000_s7 + $0x68] ss:$24 sps:$4 sm:$0xff]   ;;  %v826_v50 = vld [vmem:[%s1000_s7 + $0x14] ss:$24 sps:$4 sm:$0xff]   ;;  %v835_v51 = vld [vmem:[%s1000_s7 + $0x98] ss:$24 sps:$4 sm:$0xff]  }
  0x32   : > { %447 = vmatpush1.bf16.msra.mxu0 %v808_v33  ;;  %v267_v48 = vld [vmem:[%s1000_s7 + $0xc8] sm:$0xff]  ;;  %v427_v49 = vsel %vm425_vm0, %v757_v45, 0  ;;  %v832_v56 = vld [vmem:[%s1000_s7 + $0x44] ss:$24 sps:$4 sm:$0xff]   ;;  %v830_v58 = vld [vmem:[%s1000_s7 + $0x40] ss:$24 sps:$4 sm:$0xff]  }
  0x33   : > { %448 = vmatprep.subr.bf16.mxu0 %v809_v34  ;;  %v760_v53 = vcombine.high %v267_v48, %v267_v48  ;;  %v759_v54 = vcombine.low %v267_v48, %v267_v48  ;;  %v824_v55 = vld [vmem:[%s1000_s7 + $0x10] ss:$24 sps:$4 sm:$0xff]   ;;  %v838_v59 = vld [vmem:[%s1000_s7 + $0x74] ss:$24 sps:$4 sm:$0xff]   ;;  %v843_v61 = vld [vmem:[%s1000_s7 + $0xa4] ss:$24 sps:$4 sm:$0xff]  }
  0x34   : > { %490 = vmatpush1.bf16.msra.mxu1 %v822_v41  ;;  %v836_v60 = vld [vmem:[%s1000_s7 + $0x70] ss:$24 sps:$4 sm:$0xff]   ;;  %v841_v63 = vld [vmem:[%s1000_s7 + $0xa0] ss:$24 sps:$4 sm:$0xff]   ;;  %s773_s12 = smul.u32 (%p921_p5), 48, %s726_s15 }
  0x35   : > { %491 = vmatprep.subr.bf16.mxu1 %v827_v42  ;;  %v433_v57 = vsel %vm425_vm0, %v759_v54, 0  ;;  %v268_v62 = vld [vmem:[%s1000_s7 + $0xd0] sm:$0xff] }
  0x36   : > { %449 = vmatpush1.bf16.msra.mxu0 %v811_v35  ;;  %v762_v0 = vcombine.high %v268_v62, %v268_v62  ;;  %v761_v1 = vcombine.low %v268_v62, %v268_v62  ;;  %s630_s18 = scalar_lea.vmem (%p921_p5), %s1089_s3, %s773_s12 }
  0x37   : > { %450 = vmatprep.subr.bf16.mxu0 %v812_v39 }
  0x38   : > { %492 = vmatpush1.bf16.msra.mxu1 %v829_v46  ;;  %v439_v2 = vsel %vm425_vm0, %v761_v1, 0 }
  0x39   : > { %493 = vmatprep.subr.bf16.mxu1 %v833_v47 }
  0x3a   : > { %451 = vmatpush1.bf16.msra.mxu0 %v814_v43 }
  0x3b   : > { %763 = vmatprep.subr.msk.bf16.mxu0 %vm425_vm0, %v758_v44 }
  0x3c   : > { %494 = vmatpush1.bf16.msra.mxu1 %v835_v51 }
  0x3d   : > { %765 = vmatprep.subr.msk.bf16.mxu1 %vm425_vm0, %v760_v53 }
  0x3e   : > { %453 = vmatpush1.bf16.msra.mxu0 %v427_v49 }
  0x3f   : > { %530 = vmatprep.subr.bf16.mxu0 %v826_v50 }
  0x40   : > { %496 = vmatpush1.bf16.msra.mxu1 %v433_v57 }
  0x41   : > { %764 = vmatmul.mubr.msk.bf16.vlgmr.msra.gmra.mrb[0].mxu0 %vm421_vm1, %v823_v52 }
  0x42   : > { %531 = vmatpush1.bf16.msra.mxu0 %v824_v55  ;;  %562 = vmatprep.mubr.bf16.mxu0 %v870_v27 }
  0x43   : > { %532 = vmatprep.subr.bf16.mxu0 %v832_v56  ;;  %766 = vmatmul.mubr.msk.bf16.vlgmr.msra.gmra.mrb[0].mxu1 %vm421_vm1, %v823_v52 }
  0x46   : > { %533 = vmatpush1.bf16.msra.mxu0 %v830_v58 }
  0x47   : > { %534 = vmatprep.subr.bf16.mxu0 %v838_v59 }
  0x4a   : > { %535 = vmatpush1.bf16.msra.mxu0 %v836_v60 }
  0x4b   : > { %536 = vmatprep.subr.bf16.mxu0 %v843_v61 }
  0x4e   : > { %537 = vmatpush1.bf16.msra.mxu0 %v841_v63 }
  0x4f   : > { %767 = vmatprep.subr.msk.bf16.mxu0 %vm425_vm0, %v762_v0 }
  0x52   : > { %539 = vmatpush1.bf16.msra.mxu0 %v439_v2 }
  0x55   : > { %768 = vmatmul.mubr.msk.bf16.vlgmr.msra.gmra.mrb[4].mxu0 %vm421_vm1, %v823_v52 }
  0xa9   : > { %v274_v3 = vpop.permute.xlu0 %273 }
  0xad   : > { %v279_v5 = vpop.permute.xlu0 %278 }
 0x114   : > { %v478_v4 = vpop.f32.mrb[0].mxu0 }
 0x115   : > { %v479_v6 = vadd.f32 %v478_v4, %v274_v3  ;;  %v480_v7 = vpop.f32.mrb[1].mxu0 }
 0x116   : > { %v481_v8 = vadd.f32 %v480_v7, %v274_v3  ;;  %v482_v9 = vpop.f32.mrb[2].mxu0  ;;  %v521_v19 = vpop.f32.mrb[0].mxu1 }
 0x117   : > { %vm573_vm2 = vcmp.ge.f32.partialorder %v479_v6, 0.0  ;;  %v585_v10 = vmul.f32 0.1, %v479_v6  ;;  %v483_v11 = vadd.f32 %v482_v9, %v279_v5  ;;  %v484_v12 = vpop.f32.mrb[3].mxu0  ;;  %v522_v21 = vadd.f32 %v521_v19, %v274_v3  ;;  %v523_v22 = vpop.f32.mrb[1].mxu1 }
 0x118   : > { %vm574_vm3 = vcmp.ge.f32.partialorder %v481_v8, 0.0  ;;  %v586_v13 = vmul.f32 0.1, %v481_v8  ;;  %v485_v14 = vadd.f32 %v484_v12, %v279_v5  ;;  %v524_v24 = vadd.f32 %v523_v22, %v274_v3  ;;  %v525_v25 = vpop.f32.mrb[2].mxu1 }
 0x119   : > { %v597_v15 = vsel %vm573_vm2, %v479_v6, %v585_v10  ;;  %vm579_vm4 = vcmp.ge.f32.partialorder %v483_v11, 0.0  ;;  %v591_v16 = vmul.f32 0.1, %v483_v11  ;;  %vm575_vm6 = vcmp.ge.f32.partialorder %v522_v21, 0.0  ;;  %v527_v28 = vpop.f32.mrb[3].mxu1 }
 0x11a   : > { %609 = vst [vmem:[%s1043_s11] sm:$0xff] %v597_v15  ;;  %v598_v17 = vsel %vm574_vm3, %v481_v8, %v586_v13  ;;  %vm580_vm5 = vcmp.ge.f32.partialorder %v485_v14, 0.0  ;;  %v592_v18 = vmul.f32 0.1, %v485_v14  ;;  %v587_v26 = vmul.f32 0.1, %v522_v21 }
 0x11b   : > { %610 = vst [vmem:[%s1043_s11 + $0x8] sm:$0xff] %v598_v17  ;;  %v603_v20 = vsel %vm579_vm4, %v483_v11, %v591_v16  ;;  %v526_v27 = vadd.f32 %v525_v25, %v279_v5  ;;  %vm576_vm7 = vcmp.ge.f32.partialorder %v524_v24, 0.0  ;;  %v588_v29 = vmul.f32 0.1, %v524_v24 }
 0x11c   : > { %615 = vst [vmem:[%s1043_s11 + $0x30] sm:$0xff] %v603_v20  ;;  %v604_v23 = vsel %vm580_vm5, %v485_v14, %v592_v18  ;;  %v528_v30 = vadd.f32 %v527_v28, %v279_v5  ;;  %v599_v31 = vsel %vm575_vm6, %v522_v21, %v587_v26 }
 0x11d   : > { %616 = vst [vmem:[%s1043_s11 + $0x38] sm:$0xff] %v604_v23  ;;  %vm581_vm8 = vcmp.ge.f32.partialorder %v526_v27, 0.0  ;;  %v593_v32 = vmul.f32 0.1, %v526_v27  ;;  %611 = vst [vmem:[%s1043_s11 + $0x10] sm:$0xff] %v599_v31  ;;  %v600_v33 = vsel %vm576_vm7, %v524_v24, %v588_v29 }
 0x11e   : > { %vm582_vm9 = vcmp.ge.f32.partialorder %v528_v30, 0.0  ;;  %v594_v34 = vmul.f32 0.1, %v528_v30  ;;  %612 = vst [vmem:[%s1043_s11 + $0x18] sm:$0xff] %v600_v33 }
 0x11f   : > { %v605_v35 = vsel %vm581_vm8, %v526_v27, %v593_v32 }
 0x120   : > { %617 = vst [vmem:[%s1043_s11 + $0x40] sm:$0xff] %v605_v35  ;;  %v606_v36 = vsel %vm582_vm9, %v528_v30, %v594_v34 }
 0x121   : > { %618 = vst [vmem:[%s1043_s11 + $0x48] sm:$0xff] %v606_v36  ;;  %v643_v53 = vld [vmem:[%s1043_s11] sm:$0xff] (%p921_p5) }
 0x122   : > { %v645_v54 = vld [vmem:[%s1043_s11 + $0x8] sm:$0xff] (%p921_p5)  ;;  %644 = vst [vmem:[%s630_s18] sm:$0xff] (%p921_p5), %v643_v53 }
 0x123   : > { %v655_v59 = vld [vmem:[%s1043_s11 + $0x30] sm:$0xff] (%p921_p5)  ;;  %646 = vst [vmem:[%s630_s18 + $0x8] sm:$0xff] (%p921_p5), %v645_v54 }
 0x124   : > { %v647_v55 = vld [vmem:[%s1043_s11 + $0x10] sm:$0xff] (%p921_p5)  ;;  %v657_v60 = vld [vmem:[%s1043_s11 + $0x38] sm:$0xff] (%p921_p5)  ;;  %656 = vst [vmem:[%s630_s18 + $0x60] sm:$0xff] (%p921_p5), %v655_v59 }
 0x125   : > { %v649_v56 = vld [vmem:[%s1043_s11 + $0x18] sm:$0xff] (%p921_p5)  ;;  %648 = vst [vmem:[%s630_s18 + $0x10] sm:$0xff] (%p921_p5), %v647_v55  ;;  %658 = vst [vmem:[%s630_s18 + $0x68] sm:$0xff] (%p921_p5), %v657_v60 }
 0x126   : > { %650 = vst [vmem:[%s630_s18 + $0x18] sm:$0xff] (%p921_p5), %v649_v56 }
 0x127   : > { %v659_v61 = vld [vmem:[%s1043_s11 + $0x40] sm:$0xff] (%p921_p5) }
 0x128   : > { %v564_v37 = vpop.f32.mrb[4].mxu0  ;;  %660 = vst [vmem:[%s630_s18 + $0x70] sm:$0xff] (%p921_p5), %v659_v61  ;;  %v661_v62 = vld [vmem:[%s1043_s11 + $0x48] sm:$0xff] (%p921_p5) }
 0x129   : > { %v565_v38 = vadd.f32 %v564_v37, %v274_v3  ;;  %v566_v39 = vpop.f32.mrb[5].mxu0  ;;  %662 = vst [vmem:[%s630_s18 + $0x78] sm:$0xff] (%p921_p5), %v661_v62 }
 0x12a   : > { %v567_v40 = vadd.f32 %v566_v39, %v274_v3  ;;  %v568_v41 = vpop.f32.mrb[6].mxu0 }
 0x12b   : > { %vm577_vm10 = vcmp.ge.f32.partialorder %v565_v38, 0.0  ;;  %v589_v42 = vmul.f32 0.1, %v565_v38  ;;  %v569_v43 = vadd.f32 %v568_v41, %v279_v5  ;;  %v570_v44 = vpop.f32.mrb[7].mxu0  ;;  %627 = sbr.rel (!%p921_p5) target bundleno = 314 (0x13a), region = 59 }
 0x12c   : > { %vm578_vm11 = vcmp.ge.f32.partialorder %v567_v40, 0.0  ;;  %v590_v45 = vmul.f32 0.1, %v567_v40  ;;  %v571_v46 = vadd.f32 %v570_v44, %v279_v5 }
 0x12d   : > { %v601_v47 = vsel %vm577_vm10, %v565_v38, %v589_v42  ;;  %vm583_vm12 = vcmp.ge.f32.partialorder %v569_v43, 0.0  ;;  %v595_v48 = vmul.f32 0.1, %v569_v43 }
 0x12e   : > { %613 = vst [vmem:[%s1043_s11 + $0x20] sm:$0xff] %v601_v47  ;;  %v602_v49 = vsel %vm578_vm11, %v567_v40, %v590_v45  ;;  %vm584_vm13 = vcmp.ge.f32.partialorder %v571_v46, 0.0  ;;  %v596_v50 = vmul.f32 0.1, %v571_v46 }
 0x12f   : > { %614 = vst [vmem:[%s1043_s11 + $0x28] sm:$0xff] %v602_v49  ;;  %v607_v51 = vsel %vm583_vm12, %v569_v43, %v595_v48 }
 0x130   : > { %619 = vst [vmem:[%s1043_s11 + $0x50] sm:$0xff] %v607_v51  ;;  %v608_v52 = vsel %vm584_vm13, %v571_v46, %v596_v50 }
 0x131   : > { %620 = vst [vmem:[%s1043_s11 + $0x58] sm:$0xff] %v608_v52 }
 0x135   : > { %v651_v57 = vld [vmem:[%s1043_s11 + $0x20] sm:$0xff] }
 0x136   : > { %v653_v58 = vld [vmem:[%s1043_s11 + $0x28] sm:$0xff]  ;;  %652 = vst [vmem:[%s630_s18 + $0x20] sm:$0xff] %v651_v57 }
 0x137   : > { %654 = vst [vmem:[%s630_s18 + $0x28] sm:$0xff] %v653_v58  ;;  %v663_v63 = vld [vmem:[%s1043_s11 + $0x50] sm:$0xff] }
 0x138   : > { %v665_v0 = vld [vmem:[%s1043_s11 + $0x58] sm:$0xff]  ;;  %664 = vst [vmem:[%s630_s18 + $0x80] sm:$0xff] %v663_v63 }
 0x139   : > { %666 = vst [vmem:[%s630_s18 + $0x88] sm:$0xff] %v665_v0 }
 0x13a PF: > { %p10_p10 = scmp.ge.s32.totalorder %s908_s16, 4   ;;  %s1091_s12 = smov %s864_s13 }
 0x13b   : > { %s1092_s13 = smov %s919_s19  ;;  %s1093_s14 = smov %s908_s16 }
 0x13c   :  { %12 = sbr.rel (!%p10_p10) target bundleno = 2 (0x2), region = 113 }

// kernel: emission_decoder_swe_forward.9
= control target key start
LH: loop header
LB: loop body
LE: loop exit
PB: predicated region body
PF: predicated region fallthrough
CT: control target
= control target key end

     0   :  { %s1645_s12 = smov 0   ;;  %s1647_s13 = smov 0   ;;  %s1992_s0 = inlined_call_operand.vmem [shape: bf16[4,36], index: 0, kind: input, shape index: {}]   ;;  %s1993_s1 = inlined_call_operand.vmem [shape: bf16[36,6144], index: 1, kind: input, shape index: {}]   ;;  %s1994_s2 = inlined_call_operand.vmem [shape: f32[4,1], index: 2, kind: input, shape index: {}]   ;;  %s1995_s3 = inlined_call_operand.vmem [shape: f32[4,6144], index: 3, kind: output, shape index: {}]  }
   0x1   :  { %s1649_s14 = smov 0  }
   0x2 LB: > { %s1442_s15 = sadd.s32 4294967295, %s1622_s14   ;;  %s1662_s16 = sadd.s32 1, %s1622_s14   ;;  %s1622_s14 = sphi %s1649_s14, %s1998_s14   ;;  %s1618_s13 = sphi %s1647_s13, %s1997_s13   ;;  %s1614_s12 = sphi %s1645_s12, %s1996_s12  }
   0x3   : > { %s38_s17 = ssub.s32 %s1622_s14, %s1662_s16  ;;  %s41_s18 = sadd.s32 1, %s1618_s13 }
   0x4   : > { %p39_p0 = scmp.eq.s32.totalorder %s38_s17, 0  ;;  %p48_p1 = scmp.ne.s32.totalorder %s1618_s13, %s1614_s12 }
   0x5   : > { %p49_p2 = scmp.eq.s32.totalorder %s1622_s14, 0  ;;  %p1445_p4 = scmp.ge.s32.totalorder %s1622_s14, 2 }
   0x6   : > { %s1671_s19 = scalar_select %p39_p0, %s1618_s13, %s41_s18  }
   0x7   : > { %p50_p3 = por %p49_p2, %p48_p1  ;;  %127 = sbr.rel (%p1445_p4) target bundleno = 49 (0x31), region = 24 }
   0xe   : > { %130 = sbr.rel (!%p50_p3) target bundleno = 49 (0x31), region = 28  ;;  %s132_s20 = sand.u32 (%p50_p3), 1, %s1618_s13  }
   0xf   : > { %s1547_s21 = smul.u32 (%p50_p3), 96, %s1622_s14 }
  0x10   : > { %s1548_s22 = smul.u32 (%p50_p3), 480, %s132_s20 }
  0x11   : > { %s1679_s25 = scalar_lea.vmem (%p50_p3), %s1993_s1, %s1547_s21 }
  0x12   : > { %v150_v0 = vld [vmem:[%s1679_s25] sm:$0xff] (%p50_p3)  ;;  %v152_v1 = vld [vmem:[%s1679_s25 + $0x8] sm:$0xff] (%p50_p3)  ;;  %v154_v2 = vld [vmem:[%s1679_s25 + $0x10] sm:$0xff] (%p50_p3)  ;;  %s1684_s26 = scalar_lea.vmem (%p50_p3), [#allocation2], %s1548_s22 }
  0x13   : > { %151 = vst [vmem:[%s1684_s26] sm:$0xff] (%p50_p3), %v150_v0  ;;  %153 = vst [vmem:[%s1684_s26 + $0x8] sm:$0xff] (%p50_p3), %v152_v1  ;;  %v156_v3 = vld [vmem:[%s1679_s25 + $0x18] sm:$0xff] (%p50_p3)  ;;  %v158_v4 = vld [vmem:[%s1679_s25 + $0x20] sm:$0xff] (%p50_p3) }
  0x14   : > { %155 = vst [vmem:[%s1684_s26 + $0x10] sm:$0xff] (%p50_p3), %v154_v2  ;;  %v160_v5 = vld [vmem:[%s1679_s25 + $0x28] sm:$0xff] (%p50_p3)  ;;  %157 = vst [vmem:[%s1684_s26 + $0x18] sm:$0xff] (%p50_p3), %v156_v3  ;;  %v162_v6 = vld [vmem:[%s1679_s25 + $0x30] sm:$0xff] (%p50_p3) }
  0x15   : > { %159 = vst [vmem:[%s1684_s26 + $0x20] sm:$0xff] %v158_v4  ;;  %161 = vst [vmem:[%s1684_s26 + $0x28] sm:$0xff] %v160_v5  ;;  %v164_v7 = vld [vmem:[%s1679_s25 + $0x38] sm:$0xff]  ;;  %v166_v8 = vld [vmem:[%s1679_s25 + $0x40] sm:$0xff] }
  0x16   : > { %163 = vst [vmem:[%s1684_s26 + $0x30] sm:$0xff] %v162_v6  ;;  %165 = vst [vmem:[%s1684_s26 + $0x38] sm:$0xff] %v164_v7  ;;  %v168_v9 = vld [vmem:[%s1679_s25 + $0x48] sm:$0xff]  ;;  %v170_v10 = vld [vmem:[%s1679_s25 + $0x50] sm:$0xff] }
  0x17   : > { %167 = vst [vmem:[%s1684_s26 + $0x40] sm:$0xff] %v166_v8  ;;  %v172_v11 = vld [vmem:[%s1679_s25 + $0x58] sm:$0xff]  ;;  %169 = vst [vmem:[%s1684_s26 + $0x48] sm:$0xff] %v168_v9  ;;  %v174_v12 = vld [vmem:[%s1679_s25 + $0xc0] sm:$0xff] }
  0x18   : > { %171 = vst [vmem:[%s1684_s26 + $0x50] sm:$0xff] %v170_v10  ;;  %173 = vst [vmem:[%s1684_s26 + $0x58] sm:$0xff] %v172_v11  ;;  %v176_v13 = vld [vmem:[%s1679_s25 + $0xc8] sm:$0xff]  ;;  %v178_v14 = vld [vmem:[%s1679_s25 + $0xd0] sm:$0xff] }
  0x19   : > { %175 = vst [vmem:[%s1684_s26 + $0x60] sm:$0xff] %v174_v12  ;;  %177 = vst [vmem:[%s1684_s26 + $0x68] sm:$0xff] %v176_v13  ;;  %v180_v15 = vld [vmem:[%s1679_s25 + $0xd8] sm:$0xff]  ;;  %v182_v16 = vld [vmem:[%s1679_s25 + $0xe0] sm:$0xff] }
  0x1a   : > { %179 = vst [vmem:[%s1684_s26 + $0x70] sm:$0xff] %v178_v14  ;;  %v184_v17 = vld [vmem:[%s1679_s25 + $0xe8] sm:$0xff]  ;;  %181 = vst [vmem:[%s1684_s26 + $0x78] sm:$0xff] %v180_v15  ;;  %v186_v18 = vld [vmem:[%s1679_s25 + $0xf0] sm:$0xff] }
  0x1b   : > { %183 = vst [vmem:[%s1684_s26 + $0x80] sm:$0xff] %v182_v16  ;;  %185 = vst [vmem:[%s1684_s26 + $0x88] sm:$0xff] %v184_v17  ;;  %v188_v19 = vld [vmem:[%s1679_s25 + $0xf8] sm:$0xff]  ;;  %v190_v20 = vld [vmem:[%s1679_s25 + $0x100] sm:$0xff] }
  0x1c   : > { %187 = vst [vmem:[%s1684_s26 + $0x90] sm:$0xff] %v186_v18  ;;  %189 = vst [vmem:[%s1684_s26 + $0x98] sm:$0xff] %v188_v19  ;;  %v192_v21 = vld [vmem:[%s1679_s25 + $0x108] sm:$0xff]  ;;  %v194_v22 = vld [vmem:[%s1679_s25 + $0x110] sm:$0xff] }
  0x1d   : > { %191 = vst [vmem:[%s1684_s26 + $0xa0] sm:$0xff] %v190_v20  ;;  %v196_v23 = vld [vmem:[%s1679_s25 + $0x118] sm:$0xff]  ;;  %193 = vst [vmem:[%s1684_s26 + $0xa8] sm:$0xff] %v192_v21  ;;  %v198_v24 = vld [vmem:[%s1679_s25 + $0x180] sm:$0xff] }
  0x1e   : > { %195 = vst [vmem:[%s1684_s26 + $0xb0] sm:$0xff] %v194_v22  ;;  %197 = vst [vmem:[%s1684_s26 + $0xb8] sm:$0xff] %v196_v23  ;;  %v200_v25 = vld [vmem:[%s1679_s25 + $0x188] sm:$0xff]  ;;  %v202_v26 = vld [vmem:[%s1679_s25 + $0x190] sm:$0xff] }
  0x1f   : > { %199 = vst [vmem:[%s1684_s26 + $0xc0] sm:$0xff] %v198_v24  ;;  %201 = vst [vmem:[%s1684_s26 + $0xc8] sm:$0xff] %v200_v25  ;;  %v204_v27 = vld [vmem:[%s1679_s25 + $0x198] sm:$0xff]  ;;  %v206_v28 = vld [vmem:[%s1679_s25 + $0x1a0] sm:$0xff] }
  0x20   : > { %203 = vst [vmem:[%s1684_s26 + $0xd0] sm:$0xff] %v202_v26  ;;  %v208_v29 = vld [vmem:[%s1679_s25 + $0x1a8] sm:$0xff]  ;;  %205 = vst [vmem:[%s1684_s26 + $0xd8] sm:$0xff] %v204_v27  ;;  %v210_v30 = vld [vmem:[%s1679_s25 + $0x1b0] sm:$0xff] }
  0x21   : > { %207 = vst [vmem:[%s1684_s26 + $0xe0] sm:$0xff] %v206_v28  ;;  %209 = vst [vmem:[%s1684_s26 + $0xe8] sm:$0xff] %v208_v29  ;;  %v212_v31 = vld [vmem:[%s1679_s25 + $0x1b8] sm:$0xff]  ;;  %v214_v32 = vld [vmem:[%s1679_s25 + $0x1c0] sm:$0xff] }
  0x22   : > { %211 = vst [vmem:[%s1684_s26 + $0xf0] sm:$0xff] %v210_v30  ;;  %213 = vst [vmem:[%s1684_s26 + $0xf8] sm:$0xff] %v212_v31  ;;  %v216_v33 = vld [vmem:[%s1679_s25 + $0x1c8] sm:$0xff]  ;;  %v218_v34 = vld [vmem:[%s1679_s25 + $0x1d0] sm:$0xff] }
  0x23   : > { %215 = vst [vmem:[%s1684_s26 + $0x100] sm:$0xff] %v214_v32  ;;  %v220_v35 = vld [vmem:[%s1679_s25 + $0x1d8] sm:$0xff]  ;;  %217 = vst [vmem:[%s1684_s26 + $0x108] sm:$0xff] %v216_v33  ;;  %v222_v36 = vld [vmem:[%s1679_s25 + $0x240] sm:$0xff] }
  0x24   : > { %219 = vst [vmem:[%s1684_s26 + $0x110] sm:$0xff] %v218_v34  ;;  %221 = vst [vmem:[%s1684_s26 + $0x118] sm:$0xff] %v220_v35  ;;  %v224_v37 = vld [vmem:[%s1679_s25 + $0x248] sm:$0xff]  ;;  %v226_v38 = vld [vmem:[%s1679_s25 + $0x250] sm:$0xff] }
  0x25   : > { %223 = vst [vmem:[%s1684_s26 + $0x120] sm:$0xff] %v222_v36  ;;  %225 = vst [vmem:[%s1684_s26 + $0x128] sm:$0xff] %v224_v37  ;;  %v228_v39 = vld [vmem:[%s1679_s25 + $0x258] sm:$0xff]  ;;  %v230_v40 = vld [vmem:[%s1679_s25 + $0x260] sm:$0xff] }
  0x26   : > { %227 = vst [vmem:[%s1684_s26 + $0x130] sm:$0xff] %v226_v38  ;;  %v232_v41 = vld [vmem:[%s1679_s25 + $0x268] sm:$0xff]  ;;  %229 = vst [vmem:[%s1684_s26 + $0x138] sm:$0xff] %v228_v39  ;;  %v234_v42 = vld [vmem:[%s1679_s25 + $0x270] sm:$0xff] }
  0x27   : > { %231 = vst [vmem:[%s1684_s26 + $0x140] sm:$0xff] %v230_v40  ;;  %233 = vst [vmem:[%s1684_s26 + $0x148] sm:$0xff] %v232_v41  ;;  %v236_v43 = vld [vmem:[%s1679_s25 + $0x278] sm:$0xff]  ;;  %v238_v44 = vld [vmem:[%s1679_s25 + $0x280] sm:$0xff] }
  0x28   : > { %235 = vst [vmem:[%s1684_s26 + $0x150] sm:$0xff] %v234_v42  ;;  %237 = vst [vmem:[%s1684_s26 + $0x158] sm:$0xff] %v236_v43  ;;  %v240_v45 = vld [vmem:[%s1679_s25 + $0x288] sm:$0xff]  ;;  %v242_v46 = vld [vmem:[%s1679_s25 + $0x290] sm:$0xff] }
  0x29   : > { %239 = vst [vmem:[%s1684_s26 + $0x160] sm:$0xff] %v238_v44  ;;  %v244_v47 = vld [vmem:[%s1679_s25 + $0x298] sm:$0xff]  ;;  %241 = vst [vmem:[%s1684_s26 + $0x168] sm:$0xff] %v240_v45  ;;  %v246_v48 = vld [vmem:[%s1679_s25 + $0x300] sm:$0xff] }
  0x2a   : > { %243 = vst [vmem:[%s1684_s26 + $0x170] sm:$0xff] %v242_v46  ;;  %245 = vst [vmem:[%s1684_s26 + $0x178] sm:$0xff] %v244_v47  ;;  %v248_v49 = vld [vmem:[%s1679_s25 + $0x308] sm:$0xff]  ;;  %v250_v50 = vld [vmem:[%s1679_s25 + $0x310] sm:$0xff] }
  0x2b   : > { %247 = vst [vmem:[%s1684_s26 + $0x180] sm:$0xff] %v246_v48  ;;  %249 = vst [vmem:[%s1684_s26 + $0x188] sm:$0xff] %v248_v49  ;;  %v252_v51 = vld [vmem:[%s1679_s25 + $0x318] sm:$0xff]  ;;  %v254_v52 = vld [vmem:[%s1679_s25 + $0x320] sm:$0xff] }
  0x2c   : > { %251 = vst [vmem:[%s1684_s26 + $0x190] sm:$0xff] %v250_v50  ;;  %v256_v53 = vld [vmem:[%s1679_s25 + $0x328] sm:$0xff]  ;;  %253 = vst [vmem:[%s1684_s26 + $0x198] sm:$0xff] %v252_v51  ;;  %v258_v54 = vld [vmem:[%s1679_s25 + $0x330] sm:$0xff] }
  0x2d   : > { %255 = vst [vmem:[%s1684_s26 + $0x1a0] sm:$0xff] %v254_v52  ;;  %257 = vst [vmem:[%s1684_s26 + $0x1a8] sm:$0xff] %v256_v53  ;;  %v260_v55 = vld [vmem:[%s1679_s25 + $0x338] sm:$0xff]  ;;  %v262_v56 = vld [vmem:[%s1679_s25 + $0x340] sm:$0xff] }
  0x2e   : > { %259 = vst [vmem:[%s1684_s26 + $0x1b0] sm:$0xff] %v258_v54  ;;  %261 = vst [vmem:[%s1684_s26 + $0x1b8] sm:$0xff] %v260_v55  ;;  %v264_v57 = vld [vmem:[%s1679_s25 + $0x348] sm:$0xff]  ;;  %v266_v58 = vld [vmem:[%s1679_s25 + $0x350] sm:$0xff] }
  0x2f   : > { %263 = vst [vmem:[%s1684_s26 + $0x1c0] sm:$0xff] %v262_v56  ;;  %v268_v59 = vld [vmem:[%s1679_s25 + $0x358] sm:$0xff]  ;;  %265 = vst [vmem:[%s1684_s26 + $0x1c8] sm:$0xff] %v264_v57 }
  0x30   : > { %267 = vst [vmem:[%s1684_s26 + $0x1d0] sm:$0xff] %v266_v58  ;;  %269 = vst [vmem:[%s1684_s26 + $0x1d8] sm:$0xff] %v268_v59 }
  0x31 PF: > { %p1447_p5 = scmp.ge.s32.totalorder %s1622_s14, 1  ;;  %p274_p6 = scmp.lt.s32.totalorder %s1622_s14, 3 }
  0x33   : > { %p275_p7 = pnand %p1447_p5, %p274_p6 }
  0x34   : > { %s281_s27 = sand.u32 (!%p275_p7), 1, %s1614_s12   ;;  %v1624_v60 = vmov (!%p275_p7), 0   ;;  %v373_v61 = vld [vmem:[%s1994_s2] sm:$0xf] (!%p275_p7)  ;;  %vm683_vm0 = vcmask (!%p275_p7), 1041408   ;;  %vm679_vm1 = vcmask (!%p275_p7), 293888  }
  0x35   : > { %278 = sbr.rel (%p275_p7) target bundleno = 355 (0x163), region = 51  ;;  %788 = vmatprep.mubr.bf16.mxu0 (!%p275_p7), %v1624_v60  ;;  %829 = vmatprep.mubr.bf16.mxu1 (!%p275_p7), %v1624_v60  ;;  %v1839_v32 = vld [vmem:[%s1992_s0] sm:$0x3] (!%p275_p7) }
  0x36   : > { %s1549_s28 = smul.u32 (!%p275_p7), 480, %s281_s27  ;;  %1575 = vset.pattern.permute.xlu0 (!%p275_p7), %v1624_v60 }
  0x37   : > { %376 = vperm.xlu0 (!%p275_p7), %1575, %v373_v61   ;;  %s305_s7 = smul.u32 (!%p275_p7), 24, %s1442_s15 }
  0x38   : > { %s1812_s4 = scalar_lea.vmem (!%p275_p7), [#allocation2], %s1549_s28 }
  0x39   : > { %v313_v62 = vld [vmem:[%s1812_s4] sm:$0xff] (!%p275_p7)  ;;  %v314_v0 = vld [vmem:[%s1812_s4 + $0x8] sm:$0xff] (!%p275_p7)  ;;  %v315_v20 = vld [vmem:[%s1812_s4 + $0x10] sm:$0xff] (!%p275_p7)  ;;  %p306_p8 = scmp.lt.s32.totalorder (!%p275_p7), %s305_s7, 47 }
  0x3a   : > { %v325_v63 = vld [vmem:[%s1812_s4 + $0x60] sm:$0xff] (!%p275_p7)  ;;  %v326_v2 = vld [vmem:[%s1812_s4 + $0x68] sm:$0xff] (!%p275_p7)  ;;  %v327_v21 = vld [vmem:[%s1812_s4 + $0x70] sm:$0xff] (!%p275_p7) }
  0x3b   : > { %v1450_v1 = vcombine.high (!%p275_p7), %v313_v62, %v325_v63  ;;  %v1449_v3 = vcombine.low (!%p275_p7), %v313_v62, %v325_v63  ;;  %v337_v4 = vld [vmem:[%s1812_s4 + $0xc0] sm:$0xff] (!%p275_p7)  ;;  %v1452_v6 = vcombine.high (!%p275_p7), %v314_v0, %v326_v2  ;;  %v1451_v7 = vcombine.low (!%p275_p7), %v314_v0, %v326_v2  ;;  %v338_v9 = vld [vmem:[%s1812_s4 + $0xc8] sm:$0xff] (!%p275_p7)  ;;  %v316_v22 = vld [vmem:[%s1812_s4 + $0x18] sm:$0xff] (!%p275_p7) }
  0x3c   : > { %v349_v5 = vld [vmem:[%s1812_s4 + $0x120] sm:$0xff]  ;;  %v350_v10 = vld [vmem:[%s1812_s4 + $0x128] sm:$0xff]  ;;  %v328_v23 = vld [vmem:[%s1812_s4 + $0x78] sm:$0xff]  ;;  %v1454_v25 = vcombine.high %v315_v20, %v327_v21  ;;  %v1453_v33 = vcombine.low %v315_v20, %v327_v21  ;;  %s2000_s7 = smov (!%p306_p8, %s305_s7), 47 }
  0x3d   : > { %v1474_v8 = vcombine.high %v337_v4, %v349_v5  ;;  %v361_v11 = vld [vmem:[%s1812_s4 + $0x180] sm:$0x33]  ;;  %756 = vmatprep.subr.bf16.mxu0 %v1450_v1  ;;  %v1476_v12 = vcombine.high %v338_v9, %v350_v10  ;;  %v362_v13 = vld [vmem:[%s1812_s4 + $0x188] sm:$0x33]  ;;  %797 = vmatprep.subr.bf16.mxu1 %v1452_v6  ;;  %v1473_v14 = vcombine.low %v337_v4, %v349_v5  ;;  %v339_v28 = vld [vmem:[%s1812_s4 + $0xd0] sm:$0xff]  ;;  %s1448_s8 = sshll.u32 %s2000_s7, 2 }
  0x3e   : > { %757 = vmatpush1.bf16.msra.mxu0 %v1449_v3  ;;  %798 = vmatpush1.bf16.msra.mxu1 %v1451_v7  ;;  %v1475_v15 = vcombine.low %v338_v9, %v350_v10  ;;  %v1498_v16 = vcombine.high %v361_v11, %v361_v11  ;;  %v1497_v17 = vcombine.low %v361_v11, %v361_v11  ;;  %v351_v29 = vld [vmem:[%s1812_s4 + $0x130] sm:$0xff]  ;;  %v340_v30 = vld [vmem:[%s1812_s4 + $0xd8] sm:$0xff]  ;;  %v317_v45 = vld [vmem:[%s1812_s4 + $0x20] sm:$0xff]  ;;  %s1948_s11 = scalar_lea.vmem %s1995_s3, %s1448_s8 }
  0x3f   : > { %758 = vmatprep.subr.bf16.mxu0 %v1474_v8  ;;  %799 = vmatprep.subr.bf16.mxu1 %v1476_v12  ;;  %v1500_v18 = vcombine.high %v362_v13, %v362_v13  ;;  %v1499_v19 = vcombine.low %v362_v13, %v362_v13  ;;  %v1456_v27 = vcombine.high %v316_v22, %v328_v23  ;;  %v352_v31 = vld [vmem:[%s1812_s4 + $0x138] sm:$0xff]  ;;  %v363_v37 = vld [vmem:[%s1812_s4 + $0x190] sm:$0x33]  ;;  %v329_v46 = vld [vmem:[%s1812_s4 + $0x80] sm:$0xff] }
  0x40   : > { %v685_v24 = vsel %vm683_vm0, %v1497_v17, 0  ;;  %v1455_v34 = vcombine.low %v316_v22, %v328_v23  ;;  %v1478_v35 = vcombine.high %v339_v28, %v351_v29  ;;  %v1480_v36 = vcombine.high %v340_v30, %v352_v31  ;;  %v364_v38 = vld [vmem:[%s1812_s4 + $0x198] sm:$0x33]  ;;  %v318_v47 = vld [vmem:[%s1812_s4 + $0x28] sm:$0xff]  ;;  %v341_v53 = vld [vmem:[%s1812_s4 + $0xe0] sm:$0xff] }
  0x41   : > { %v691_v26 = vsel %vm683_vm0, %v1499_v19, 0  ;;  %v1477_v39 = vcombine.low %v339_v28, %v351_v29  ;;  %v1479_v40 = vcombine.low %v340_v30, %v352_v31  ;;  %v1502_v41 = vcombine.high %v363_v37, %v363_v37  ;;  %v330_v48 = vld [vmem:[%s1812_s4 + $0x88] sm:$0xff]  ;;  %v353_v54 = vld [vmem:[%s1812_s4 + $0x140] sm:$0xff]  ;;  %v319_v6 = vld [vmem:[%s1812_s4 + $0x30] sm:$0xff] }
  0x42   : > { %759 = vmatpush1.bf16.msra.mxu0 %v1473_v14  ;;  %800 = vmatpush1.bf16.msra.mxu1 %v1475_v15  ;;  %v1501_v42 = vcombine.low %v363_v37, %v363_v37  ;;  %v1504_v43 = vcombine.high %v364_v38, %v364_v38  ;;  %v1503_v44 = vcombine.low %v364_v38, %v364_v38  ;;  %v342_v55 = vld [vmem:[%s1812_s4 + $0xe8] sm:$0xff]  ;;  %v365_v62 = vld [vmem:[%s1812_s4 + $0x1a0] sm:$0x33]  ;;  %v331_v7 = vld [vmem:[%s1812_s4 + $0x90] sm:$0xff] }
  0x43   : > { %1521 = vmatprep.subr.msk.bf16.mxu0 %vm683_vm0, %v1498_v16  ;;  %1523 = vmatprep.subr.msk.bf16.mxu1 %vm683_vm0, %v1500_v18  ;;  %v1458_v50 = vcombine.high %v317_v45, %v329_v46  ;;  %v1460_v52 = vcombine.high %v318_v47, %v330_v48  ;;  %v354_v56 = vld [vmem:[%s1812_s4 + $0x148] sm:$0xff]  ;;  %v1457_v57 = vcombine.low %v317_v45, %v329_v46  ;;  %v320_v8 = vld [vmem:[%s1812_s4 + $0x38] sm:$0xff]  ;;  %v343_v14 = vld [vmem:[%s1812_s4 + $0xf0] sm:$0xff] }
  0x44   : > { %v697_v49 = vsel %vm683_vm0, %v1501_v42, 0  ;;  %v703_v51 = vsel %vm683_vm0, %v1503_v44, 0  ;;  %v1459_v58 = vcombine.low %v318_v47, %v330_v48  ;;  %v1482_v59 = vcombine.high %v341_v53, %v353_v54  ;;  %v366_v63 = vld [vmem:[%s1812_s4 + $0x1a8] sm:$0x33]  ;;  %v332_v9 = vld [vmem:[%s1812_s4 + $0x98] sm:$0xff]  ;;  %v355_v15 = vld [vmem:[%s1812_s4 + $0x150] sm:$0xff] }
  0x45   : > { %v1484_v61 = vcombine.high %v342_v55, %v354_v56  ;;  %v1481_v0 = vcombine.low %v341_v53, %v353_v54  ;;  %v1483_v1 = vcombine.low %v342_v55, %v354_v56  ;;  %v1506_v2 = vcombine.high %v365_v62, %v365_v62  ;;  %v344_v16 = vld [vmem:[%s1812_s4 + $0xf8] sm:$0xff]  ;;  %v367_v22 = vld [vmem:[%s1812_s4 + $0x1b0] sm:$0x33]  ;;  %v321_v30 = vld [vmem:[%s1812_s4 + $0x40] sm:$0xff] }
  0x46   : > { %761 = vmatpush1.bf16.msra.mxu0 %v685_v24  ;;  %802 = vmatpush1.bf16.msra.mxu1 %v691_v26  ;;  %v1505_v3 = vcombine.low %v365_v62, %v365_v62  ;;  %v1508_v4 = vcombine.high %v366_v63, %v366_v63  ;;  %v1507_v5 = vcombine.low %v366_v63, %v366_v63  ;;  %v356_v17 = vld [vmem:[%s1812_s4 + $0x158] sm:$0xff]  ;;  %v333_v31 = vld [vmem:[%s1812_s4 + $0xa0] sm:$0xff]  ;;  %v358_v42 = vld [vmem:[%s1812_s4 + $0x168] sm:$0xff] }
  0x47   : > { %838 = vmatprep.subr.bf16.mxu0 %v1454_v25  ;;  %879 = vmatprep.subr.bf16.mxu1 %v1456_v27  ;;  %v1462_v11 = vcombine.high %v319_v6, %v331_v7  ;;  %v1464_v13 = vcombine.high %v320_v8, %v332_v9  ;;  %v1461_v18 = vcombine.low %v319_v6, %v331_v7  ;;  %v368_v23 = vld [vmem:[%s1812_s4 + $0x1b8] sm:$0x33]  ;;  %v369_v47 = vld [vmem:[%s1812_s4 + $0x1c0] sm:$0x33]  ;;  %v370_v48 = vld [vmem:[%s1812_s4 + $0x1c8] sm:$0x33] }
  0x48   : > { %v709_v10 = vsel %vm683_vm0, %v1505_v3, 0  ;;  %v715_v12 = vsel %vm683_vm0, %v1507_v5, 0  ;;  %v1463_v19 = vcombine.low %v320_v8, %v332_v9  ;;  %v1486_v20 = vcombine.high %v343_v14, %v355_v15  ;;  %v323_v55 = vld [vmem:[%s1812_s4 + $0x50] sm:$0xff]  ;;  %v360_v3 = vld [vmem:[%s1812_s4 + $0x178] sm:$0xff] }
  0x49   : > { %1522 = vmatmul.mubr.msk.bf16.vlgmr.msra.gmra.mrb[0].mxu0 %vm679_vm1, %v1839_v32  ;;  %1524 = vmatmul.mubr.msk.bf16.vlgmr.msra.gmra.mrb[0].mxu1 %vm679_vm1, %v1839_v32  ;;  %v1488_v21 = vcombine.high %v344_v16, %v356_v17  ;;  %v1485_v24 = vcombine.low %v343_v14, %v355_v15  ;;  %v1487_v25 = vcombine.low %v344_v16, %v356_v17  ;;  %v335_v56 = vld [vmem:[%s1812_s4 + $0xb0] sm:$0xff]  ;;  %v372_v9 = vld [vmem:[%s1812_s4 + $0x1d8] sm:$0x33] }
  0x4a   : > { %839 = vmatpush1.bf16.msra.mxu0 %v1453_v33  ;;  %880 = vmatpush1.bf16.msra.mxu1 %v1455_v34  ;;  %v1510_v26 = vcombine.high %v367_v22, %v367_v22  ;;  %v1509_v27 = vcombine.low %v367_v22, %v367_v22  ;;  %v1512_v28 = vcombine.high %v368_v23, %v368_v23  ;;  %v322_v33 = vld [vmem:[%s1812_s4 + $0x48] sm:$0xff]  ;;  %v371_v8 = vld [vmem:[%s1812_s4 + $0x1d0] sm:$0x33] }
  0x4b   : > { %840 = vmatprep.subr.bf16.mxu0 %v1478_v35  ;;  %881 = vmatprep.subr.bf16.mxu1 %v1480_v36  ;;  %v1511_v29 = vcombine.low %v368_v23, %v368_v23  ;;  %v334_v34 = vld [vmem:[%s1812_s4 + $0xa8] sm:$0xff]  ;;  %v1466_v36 = vcombine.high %v321_v30, %v333_v31  ;;  %v1516_v53 = vcombine.high %v370_v48, %v370_v48 }
  0x4c   : > { %870 = vmatprep.mubr.bf16.mxu0 %v1624_v60  ;;  %911 = vmatprep.mubr.bf16.mxu1 %v1624_v60  ;;  %v721_v35 = vsel %vm683_vm0, %v1509_v27, 0  ;;  %v1468_v38 = vcombine.high %v322_v33, %v334_v34  ;;  %v1467_v44 = vcombine.low %v322_v33, %v334_v34  ;;  %v1515_v54 = vcombine.low %v370_v48, %v370_v48 }
  0x4d   : > { %v727_v37 = vsel %vm683_vm0, %v1511_v29, 0  ;;  %v1520_v14 = vcombine.high %v372_v9, %v372_v9  ;;  %v1519_v15 = vcombine.low %v372_v9, %v372_v9 }
  0x4e   : > { %841 = vmatpush1.bf16.msra.mxu0 %v1477_v39  ;;  %882 = vmatpush1.bf16.msra.mxu1 %v1479_v40  ;;  %v345_v39 = vld [vmem:[%s1812_s4 + $0x100] sm:$0xff]  ;;  %v739_v62 = vsel %vm683_vm0, %v1515_v54, 0 }
  0x4f   : > { %1525 = vmatprep.subr.msk.bf16.mxu0 %vm683_vm0, %v1502_v41  ;;  %1527 = vmatprep.subr.msk.bf16.mxu1 %vm683_vm0, %v1504_v43  ;;  %v357_v40 = vld [vmem:[%s1812_s4 + $0x160] sm:$0xff]  ;;  %v346_v41 = vld [vmem:[%s1812_s4 + $0x108] sm:$0xff]  ;;  %v1465_v43 = vcombine.low %v321_v30, %v333_v31  ;;  %v751_v17 = vsel %vm683_vm0, %v1519_v15, 0 }
  0x50   : > { %v1490_v45 = vcombine.high %v345_v39, %v357_v40  ;;  %v1492_v46 = vcombine.high %v346_v41, %v358_v42 }
  0x52   : > { %843 = vmatpush1.bf16.msra.mxu0 %v697_v49  ;;  %884 = vmatpush1.bf16.msra.mxu1 %v703_v51  ;;  %v1489_v49 = vcombine.low %v345_v39, %v357_v40  ;;  %v1514_v51 = vcombine.high %v369_v47, %v369_v47 }
  0x53   : > { %920 = vmatprep.subr.bf16.mxu0 %v1458_v50  ;;  %961 = vmatprep.subr.bf16.mxu1 %v1460_v52  ;;  %v1491_v50 = vcombine.low %v346_v41, %v358_v42  ;;  %v1513_v52 = vcombine.low %v369_v47, %v369_v47 }
  0x55   : > { %1526 = vmatmul.mubr.msk.bf16.vlgmr.msra.gmra.mrb[4].mxu0 %vm679_vm1, %v1839_v32  ;;  %1528 = vmatmul.mubr.msk.bf16.vlgmr.msra.gmra.mrb[4].mxu1 %vm679_vm1, %v1839_v32 }
  0x56   : > { %921 = vmatpush1.bf16.msra.mxu0 %v1457_v57  ;;  %962 = vmatpush1.bf16.msra.mxu1 %v1459_v58  ;;  %v324_v57 = vld [vmem:[%s1812_s4 + $0x58] sm:$0xff] }
  0x57   : > { %922 = vmatprep.subr.bf16.mxu0 %v1482_v59  ;;  %963 = vmatprep.subr.bf16.mxu1 %v1484_v61  ;;  %v336_v58 = vld [vmem:[%s1812_s4 + $0xb8] sm:$0xff]  ;;  %v733_v59 = vsel %vm683_vm0, %v1513_v52, 0  ;;  %v1470_v61 = vcombine.high %v323_v55, %v335_v56 }
  0x58   : > { %952 = vmatprep.mubr.bf16.mxu0 %v1624_v60  ;;  %993 = vmatprep.mubr.bf16.mxu1 %v1624_v60  ;;  %v1472_v63 = vcombine.high %v324_v57, %v336_v58  ;;  %v1471_v5 = vcombine.low %v324_v57, %v336_v58 }
  0x5a   : > { %923 = vmatpush1.bf16.msra.mxu0 %v1481_v0  ;;  %964 = vmatpush1.bf16.msra.mxu1 %v1483_v1  ;;  %v347_v0 = vld [vmem:[%s1812_s4 + $0x110] sm:$0xff] }
  0x5b   : > { %1529 = vmatprep.subr.msk.bf16.mxu0 %vm683_vm0, %v1506_v2  ;;  %1531 = vmatprep.subr.msk.bf16.mxu1 %vm683_vm0, %v1508_v4  ;;  %v359_v1 = vld [vmem:[%s1812_s4 + $0x170] sm:$0xff]  ;;  %v348_v2 = vld [vmem:[%s1812_s4 + $0x118] sm:$0xff]  ;;  %v1469_v4 = vcombine.low %v323_v55, %v335_v56 }
  0x5c   : > { %v1494_v6 = vcombine.high %v347_v0, %v359_v1  ;;  %v1496_v7 = vcombine.high %v348_v2, %v360_v3 }
  0x5e   : > { %925 = vmatpush1.bf16.msra.mxu0 %v709_v10  ;;  %966 = vmatpush1.bf16.msra.mxu1 %v715_v12  ;;  %v1493_v10 = vcombine.low %v347_v0, %v359_v1  ;;  %v1518_v12 = vcombine.high %v371_v8, %v371_v8 }
  0x5f   : > { %1002 = vmatprep.subr.bf16.mxu0 %v1462_v11  ;;  %1043 = vmatprep.subr.bf16.mxu1 %v1464_v13  ;;  %v1495_v11 = vcombine.low %v348_v2, %v360_v3  ;;  %v1517_v13 = vcombine.low %v371_v8, %v371_v8 }
  0x61   : > { %1530 = vmatmul.mubr.msk.bf16.vlgmr.msra.gmra.mrb[8].mxu0 %vm679_vm1, %v1839_v32  ;;  %1532 = vmatmul.mubr.msk.bf16.vlgmr.msra.gmra.mrb[8].mxu1 %vm679_vm1, %v1839_v32  ;;  %v745_v16 = vsel %vm683_vm0, %v1517_v13, 0 }
  0x62   : > { %1003 = vmatpush1.bf16.msra.mxu0 %v1461_v18  ;;  %1044 = vmatpush1.bf16.msra.mxu1 %v1463_v19 }
  0x63   : > { %1004 = vmatprep.subr.bf16.mxu0 %v1486_v20  ;;  %1045 = vmatprep.subr.bf16.mxu1 %v1488_v21 }
  0x64   : > { %1034 = vmatprep.mubr.bf16.mxu0 %v1624_v60  ;;  %1075 = vmatprep.mubr.bf16.mxu1 %v1624_v60 }
  0x66   : > { %1005 = vmatpush1.bf16.msra.mxu0 %v1485_v24  ;;  %1046 = vmatpush1.bf16.msra.mxu1 %v1487_v25 }
  0x67   : > { %1533 = vmatprep.subr.msk.bf16.mxu0 %vm683_vm0, %v1510_v26  ;;  %1535 = vmatprep.subr.msk.bf16.mxu1 %vm683_vm0, %v1512_v28 }
  0x6a   : > { %1007 = vmatpush1.bf16.msra.mxu0 %v721_v35  ;;  %1048 = vmatpush1.bf16.msra.mxu1 %v727_v37 }
  0x6b   : > { %1084 = vmatprep.subr.bf16.mxu0 %v1466_v36  ;;  %1125 = vmatprep.subr.bf16.mxu1 %v1468_v38 }
  0x6d   : > { %1534 = vmatmul.mubr.msk.bf16.vlgmr.msra.gmra.mrb[12].mxu0 %vm679_vm1, %v1839_v32  ;;  %1536 = vmatmul.mubr.msk.bf16.vlgmr.msra.gmra.mrb[12].mxu1 %vm679_vm1, %v1839_v32 }
  0x6e   : > { %1085 = vmatpush1.bf16.msra.mxu0 %v1465_v43  ;;  %1126 = vmatpush1.bf16.msra.mxu1 %v1467_v44 }
  0x6f   : > { %1086 = vmatprep.subr.bf16.mxu0 %v1490_v45  ;;  %1127 = vmatprep.subr.bf16.mxu1 %v1492_v46 }
  0x70   : > { %1116 = vmatprep.mubr.bf16.mxu0 %v1624_v60  ;;  %1157 = vmatprep.mubr.bf16.mxu1 %v1624_v60 }
  0x72   : > { %1087 = vmatpush1.bf16.msra.mxu0 %v1489_v49  ;;  %1128 = vmatpush1.bf16.msra.mxu1 %v1491_v50 }
  0x73   : > { %1537 = vmatprep.subr.msk.bf16.mxu0 %vm683_vm0, %v1514_v51  ;;  %1539 = vmatprep.subr.msk.bf16.mxu1 %vm683_vm0, %v1516_v53 }
  0x76   : > { %1089 = vmatpush1.bf16.msra.mxu0 %v733_v59  ;;  %1130 = vmatpush1.bf16.msra.mxu1 %v739_v62 }
  0x77   : > { %1166 = vmatprep.subr.bf16.mxu0 %v1470_v61  ;;  %1207 = vmatprep.subr.bf16.mxu1 %v1472_v63 }
  0x79   : > { %1538 = vmatmul.mubr.msk.bf16.vlgmr.msra.gmra.mrb[16].mxu0 %vm679_vm1, %v1839_v32  ;;  %1540 = vmatmul.mubr.msk.bf16.vlgmr.msra.gmra.mrb[16].mxu1 %vm679_vm1, %v1839_v32 }
  0x7a   : > { %1167 = vmatpush1.bf16.msra.mxu0 %v1469_v4  ;;  %1208 = vmatpush1.bf16.msra.mxu1 %v1471_v5 }
  0x7b   : > { %1168 = vmatprep.subr.bf16.mxu0 %v1494_v6  ;;  %1209 = vmatprep.subr.bf16.mxu1 %v1496_v7 }
  0x7c   : > { %1198 = vmatprep.mubr.bf16.mxu0 %v1624_v60  ;;  %1239 = vmatprep.mubr.bf16.mxu1 %v1624_v60 }
  0x7e   : > { %1169 = vmatpush1.bf16.msra.mxu0 %v1493_v10  ;;  %1210 = vmatpush1.bf16.msra.mxu1 %v1495_v11 }
  0x7f   : > { %1541 = vmatprep.subr.msk.bf16.mxu0 %vm683_vm0, %v1518_v12  ;;  %1543 = vmatprep.subr.msk.bf16.mxu1 %vm683_vm0, %v1520_v14 }
  0x82   : > { %1171 = vmatpush1.bf16.msra.mxu0 %v745_v16  ;;  %1212 = vmatpush1.bf16.msra.mxu1 %v751_v17 }
  0x85   : > { %1542 = vmatmul.mubr.msk.bf16.vlgmr.msra.gmra.mrb[20].mxu0 %vm679_vm1, %v1839_v32  ;;  %1544 = vmatmul.mubr.msk.bf16.vlgmr.msra.gmra.mrb[20].mxu1 %vm679_vm1, %v1839_v32 }
  0xb6   : > { %v1939_v60 = vpop.permute.xlu0 %376 }
 0x11c   : > { %v790_v18 = vpop.f32.mrb[0].mxu0  ;;  %v831_v20 = vpop.f32.mrb[0].mxu1 }
 0x11d   : > { %v791_v19 = vadd.f32 %v790_v18, %v1939_v60  ;;  %v792_v21 = vpop.f32.mrb[1].mxu0  ;;  %v832_v22 = vadd.f32 %v831_v20, %v1939_v60  ;;  %v833_v24 = vpop.f32.mrb[1].mxu1 }
 0x11e   : > { %v793_v23 = vadd.f32 %v792_v21, %v1939_v60  ;;  %v794_v25 = vpop.f32.mrb[2].mxu0  ;;  %v834_v32 = vadd.f32 %v833_v24, %v1939_v60  ;;  %v835_v27 = vpop.f32.mrb[2].mxu1 }
 0x11f   : > { %vm1248_vm2 = vcmp.ge.f32.partialorder %v791_v19, 0.0  ;;  %v1272_v26 = vmul.f32 0.1, %v791_v19  ;;  %v795_v28 = vpop.f32.mrb[3].mxu0  ;;  %vm1250_vm3 = vcmp.ge.f32.partialorder %v832_v22, 0.0  ;;  %v836_v34 = vpop.f32.mrb[3].mxu1 }
 0x120   : > { %v1274_v29 = vmul.f32 0.1, %v832_v22  ;;  %vm1249_vm4 = vcmp.ge.f32.partialorder %v793_v23, 0.0  ;;  %v1273_v30 = vmul.f32 0.1, %v793_v23  ;;  %vm1251_vm5 = vcmp.ge.f32.partialorder %v834_v32, 0.0 }
 0x121   : > { %v1296_v31 = vsel %vm1248_vm2, %v791_v19, %v1272_v26  ;;  %v1275_v33 = vmul.f32 0.1, %v834_v32 }
 0x122   : > { %v1298_v35 = vsel %vm1250_vm3, %v832_v22, %v1274_v29  ;;  %v1297_v36 = vsel %vm1249_vm4, %v793_v23, %v1273_v30 }
 0x123   : > { %v1344_v37 = vcombine.low %v1296_v31, %v1297_v36  ;;  %v1299_v38 = vsel %vm1251_vm5, %v834_v32, %v1275_v33 }
 0x124   : > { %v1345_v39 = vcombine.low %v1298_v35, %v1299_v38 }
 0x125   : > { %1368 = vst [vmem:[%s1948_s11] sm:$0xff] %v1344_v37 }
 0x126   : > { %1369 = vst [vmem:[%s1948_s11 + $0x8] sm:$0xff] %v1345_v39 }
 0x128   : > { %v872_v40 = vpop.f32.mrb[4].mxu0  ;;  %v913_v42 = vpop.f32.mrb[4].mxu1 }
 0x129   : > { %v873_v41 = vadd.f32 %v872_v40, %v1939_v60  ;;  %v874_v43 = vpop.f32.mrb[5].mxu0  ;;  %v914_v44 = vadd.f32 %v913_v42, %v1939_v60  ;;  %v915_v46 = vpop.f32.mrb[5].mxu1 }
 0x12a   : > { %v875_v45 = vadd.f32 %v874_v43, %v1939_v60  ;;  %v876_v47 = vpop.f32.mrb[6].mxu0  ;;  %v916_v49 = vadd.f32 %v915_v46, %v1939_v60  ;;  %v917_v50 = vpop.f32.mrb[6].mxu1 }
 0x12b   : > { %vm1252_vm6 = vcmp.ge.f32.partialorder %v873_v41, 0.0  ;;  %v1276_v48 = vmul.f32 0.1, %v873_v41  ;;  %v877_v51 = vpop.f32.mrb[7].mxu0  ;;  %vm1254_vm7 = vcmp.ge.f32.partialorder %v914_v44, 0.0  ;;  %v918_v56 = vpop.f32.mrb[7].mxu1 }
 0x12c   : > { %v1278_v52 = vmul.f32 0.1, %v914_v44  ;;  %vm1253_vm8 = vcmp.ge.f32.partialorder %v875_v45, 0.0  ;;  %v1277_v53 = vmul.f32 0.1, %v875_v45  ;;  %vm1255_vm9 = vcmp.ge.f32.partialorder %v916_v49, 0.0 }
 0x12d   : > { %v1300_v54 = vsel %vm1252_vm6, %v873_v41, %v1276_v48  ;;  %v1279_v55 = vmul.f32 0.1, %v916_v49 }
 0x12e   : > { %v1302_v57 = vsel %vm1254_vm7, %v914_v44, %v1278_v52  ;;  %v1301_v58 = vsel %vm1253_vm8, %v875_v45, %v1277_v53 }
 0x12f   : > { %v1346_v59 = vcombine.low %v1300_v54, %v1301_v58  ;;  %v1303_v61 = vsel %vm1255_vm9, %v916_v49, %v1279_v55 }
 0x130   : > { %v1347_v62 = vcombine.low %v1302_v57, %v1303_v61 }
 0x131   : > { %1370 = vst [vmem:[%s1948_s11 + $0x10] sm:$0xff] %v1346_v59 }
 0x132   : > { %1371 = vst [vmem:[%s1948_s11 + $0x18] sm:$0xff] %v1347_v62 }
 0x134   : > { %v954_v63 = vpop.f32.mrb[8].mxu0  ;;  %v995_v1 = vpop.f32.mrb[8].mxu1 }
 0x135   : > { %v955_v0 = vadd.f32 %v954_v63, %v1939_v60  ;;  %v956_v2 = vpop.f32.mrb[9].mxu0  ;;  %v996_v3 = vadd.f32 %v995_v1, %v1939_v60  ;;  %v997_v5 = vpop.f32.mrb[9].mxu1 }
 0x136   : > { %v957_v4 = vadd.f32 %v956_v2, %v1939_v60  ;;  %v958_v6 = vpop.f32.mrb[10].mxu0  ;;  %v998_v8 = vadd.f32 %v997_v5, %v1939_v60  ;;  %v999_v9 = vpop.f32.mrb[10].mxu1 }
 0x137   : > { %vm1256_vm10 = vcmp.ge.f32.partialorder %v955_v0, 0.0  ;;  %v1280_v7 = vmul.f32 0.1, %v955_v0  ;;  %v959_v10 = vpop.f32.mrb[11].mxu0  ;;  %vm1258_vm11 = vcmp.ge.f32.partialorder %v996_v3, 0.0  ;;  %v1000_v15 = vpop.f32.mrb[11].mxu1 }
 0x138   : > { %v1282_v11 = vmul.f32 0.1, %v996_v3  ;;  %vm1257_vm12 = vcmp.ge.f32.partialorder %v957_v4, 0.0  ;;  %v1281_v12 = vmul.f32 0.1, %v957_v4  ;;  %vm1259_vm13 = vcmp.ge.f32.partialorder %v998_v8, 0.0 }
 0x139   : > { %v1304_v13 = vsel %vm1256_vm10, %v955_v0, %v1280_v7  ;;  %v1283_v14 = vmul.f32 0.1, %v998_v8 }
 0x13a   : > { %v1306_v16 = vsel %vm1258_vm11, %v996_v3, %v1282_v11  ;;  %v1305_v17 = vsel %vm1257_vm12, %v957_v4, %v1281_v12 }
 0x13b   : > { %v1348_v18 = vcombine.low %v1304_v13, %v1305_v17  ;;  %v1307_v19 = vsel %vm1259_vm13, %v998_v8, %v1283_v14 }
 0x13c   : > { %v1349_v20 = vcombine.low %v1306_v16, %v1307_v19 }
 0x13d   : > { %1372 = vst [vmem:[%s1948_s11 + $0x20] sm:$0xff] %v1348_v18 }
 0x13e   : > { %1373 = vst [vmem:[%s1948_s11 + $0x28] sm:$0xff] %v1349_v20 }
 0x140   : > { %v1036_v21 = vpop.f32.mrb[12].mxu0  ;;  %v1077_v23 = vpop.f32.mrb[12].mxu1 }
 0x141   : > { %v1037_v22 = vadd.f32 %v1036_v21, %v1939_v60  ;;  %v1038_v24 = vpop.f32.mrb[13].mxu0  ;;  %v1078_v25 = vadd.f32 %v1077_v23, %v1939_v60  ;;  %v1079_v32 = vpop.f32.mrb[13].mxu1 }
 0x142   : > { %v1039_v26 = vadd.f32 %v1038_v24, %v1939_v60  ;;  %v1040_v27 = vpop.f32.mrb[14].mxu0  ;;  %v1080_v29 = vadd.f32 %v1079_v32, %v1939_v60  ;;  %v1081_v30 = vpop.f32.mrb[14].mxu1 }
 0x143   : > { %vm1260_vm14 = vcmp.ge.f32.partialorder %v1037_v22, 0.0  ;;  %v1284_v28 = vmul.f32 0.1, %v1037_v22  ;;  %v1041_v31 = vpop.f32.mrb[15].mxu0  ;;  %vm1262_vm15 = vcmp.ge.f32.partialorder %v1078_v25, 0.0  ;;  %v1082_v37 = vpop.f32.mrb[15].mxu1 }
 0x144   : > { %v1286_v33 = vmul.f32 0.1, %v1078_v25  ;;  %vm1261_vm0 = vcmp.ge.f32.partialorder %v1039_v26, 0.0  ;;  %v1285_v34 = vmul.f32 0.1, %v1039_v26  ;;  %vm1263_vm1 = vcmp.ge.f32.partialorder %v1080_v29, 0.0 }
 0x145   : > { %v1308_v35 = vsel %vm1260_vm14, %v1037_v22, %v1284_v28  ;;  %v1287_v36 = vmul.f32 0.1, %v1080_v29 }
 0x146   : > { %v1310_v38 = vsel %vm1262_vm15, %v1078_v25, %v1286_v33  ;;  %v1309_v39 = vsel %vm1261_vm0, %v1039_v26, %v1285_v34 }
 0x147   : > { %v1350_v40 = vcombine.low %v1308_v35, %v1309_v39  ;;  %v1311_v41 = vsel %vm1263_vm1, %v1080_v29, %v1287_v36 }
 0x148   : > { %v1351_v42 = vcombine.low %v1310_v38, %v1311_v41 }
 0x149   : > { %1374 = vst [vmem:[%s1948_s11 + $0x30] sm:$0xff] %v1350_v40 }
 0x14a   : > { %1375 = vst [vmem:[%s1948_s11 + $0x38] sm:$0xff] %v1351_v42 }
 0x14c   : > { %v1118_v43 = vpop.f32.mrb[16].mxu0  ;;  %v1159_v45 = vpop.f32.mrb[16].mxu1 }
 0x14d   : > { %v1119_v44 = vadd.f32 %v1118_v43, %v1939_v60  ;;  %v1120_v46 = vpop.f32.mrb[17].mxu0  ;;  %v1160_v47 = vadd.f32 %v1159_v45, %v1939_v60  ;;  %v1161_v49 = vpop.f32.mrb[17].mxu1 }
 0x14e   : > { %v1121_v48 = vadd.f32 %v1120_v46, %v1939_v60  ;;  %v1122_v50 = vpop.f32.mrb[18].mxu0  ;;  %v1162_v52 = vadd.f32 %v1161_v49, %v1939_v60  ;;  %v1163_v53 = vpop.f32.mrb[18].mxu1 }
 0x14f   : > { %vm1264_vm2 = vcmp.ge.f32.partialorder %v1119_v44, 0.0  ;;  %v1288_v51 = vmul.f32 0.1, %v1119_v44  ;;  %v1123_v54 = vpop.f32.mrb[19].mxu0  ;;  %vm1266_vm3 = vcmp.ge.f32.partialorder %v1160_v47, 0.0  ;;  %v1164_v59 = vpop.f32.mrb[19].mxu1 }
 0x150   : > { %v1290_v55 = vmul.f32 0.1, %v1160_v47  ;;  %vm1265_vm4 = vcmp.ge.f32.partialorder %v1121_v48, 0.0  ;;  %v1289_v56 = vmul.f32 0.1, %v1121_v48  ;;  %vm1267_vm5 = vcmp.ge.f32.partialorder %v1162_v52, 0.0 }
 0x151   : > { %v1312_v57 = vsel %vm1264_vm2, %v1119_v44, %v1288_v51  ;;  %v1291_v58 = vmul.f32 0.1, %v1162_v52 }
 0x152   : > { %v1314_v61 = vsel %vm1266_vm3, %v1160_v47, %v1290_v55  ;;  %v1313_v62 = vsel %vm1265_vm4, %v1121_v48, %v1289_v56 }
 0x153   : > { %v1352_v63 = vcombine.low %v1312_v57, %v1313_v62  ;;  %v1315_v0 = vsel %vm1267_vm5, %v1162_v52, %v1291_v58 }
 0x154   : > { %v1353_v1 = vcombine.low %v1314_v61, %v1315_v0 }
 0x155   : > { %1376 = vst [vmem:[%s1948_s11 + $0x40] sm:$0xff] %v1352_v63 }
 0x156   : > { %1377 = vst [vmem:[%s1948_s11 + $0x48] sm:$0xff] %v1353_v1 }
 0x158   : > { %v1200_v2 = vpop.f32.mrb[20].mxu0  ;;  %v1241_v4 = vpop.f32.mrb[20].mxu1 }
 0x159   : > { %v1201_v3 = vadd.f32 %v1200_v2, %v1939_v60  ;;  %v1202_v5 = vpop.f32.mrb[21].mxu0  ;;  %v1242_v6 = vadd.f32 %v1241_v4, %v1939_v60  ;;  %v1243_v8 = vpop.f32.mrb[21].mxu1 }
 0x15a   : > { %v1203_v7 = vadd.f32 %v1202_v5, %v1939_v60  ;;  %v1204_v9 = vpop.f32.mrb[22].mxu0  ;;  %v1244_v11 = vadd.f32 %v1243_v8, %v1939_v60  ;;  %v1245_v12 = vpop.f32.mrb[22].mxu1 }
 0x15b   : > { %vm1268_vm6 = vcmp.ge.f32.partialorder %v1201_v3, 0.0  ;;  %v1292_v10 = vmul.f32 0.1, %v1201_v3  ;;  %v1205_v13 = vpop.f32.mrb[23].mxu0  ;;  %vm1270_vm7 = vcmp.ge.f32.partialorder %v1242_v6, 0.0  ;;  %v1246_v18 = vpop.f32.mrb[23].mxu1 }
 0x15c   : > { %v1294_v14 = vmul.f32 0.1, %v1242_v6  ;;  %vm1269_vm8 = vcmp.ge.f32.partialorder %v1203_v7, 0.0  ;;  %v1293_v15 = vmul.f32 0.1, %v1203_v7  ;;  %vm1271_vm9 = vcmp.ge.f32.partialorder %v1244_v11, 0.0 }
 0x15d   : > { %v1316_v16 = vsel %vm1268_vm6, %v1201_v3, %v1292_v10  ;;  %v1295_v17 = vmul.f32 0.1, %v1244_v11 }
 0x15e   : > { %v1318_v19 = vsel %vm1270_vm7, %v1242_v6, %v1294_v14  ;;  %v1317_v20 = vsel %vm1269_vm8, %v1203_v7, %v1293_v15 }
 0x15f   : > { %v1354_v21 = vcombine.low %v1316_v16, %v1317_v20  ;;  %v1319_v22 = vsel %vm1271_vm9, %v1244_v11, %v1295_v17 }
 0x160   : > { %v1355_v23 = vcombine.low %v1318_v19, %v1319_v22 }
 0x161   : > { %1378 = vst [vmem:[%s1948_s11 + $0x50] sm:$0xff] %v1354_v21 }
 0x162   : > { %1379 = vst [vmem:[%s1948_s11 + $0x58] sm:$0xff] %v1355_v23 }
 0x163 PF: > { %p10_p9 = scmp.ge.s32.totalorder %s1662_s16, 4   ;;  %s1996_s12 = smov %s1618_s13 }
 0x164   : > { %s1997_s13 = smov %s1671_s19  ;;  %s1998_s14 = smov %s1662_s16 }
 0x165   :  { %12 = sbr.rel (!%p10_p9) target bundleno = 2 (0x2), region = 90 }

</bundles_post_ra>
